<compile_context>
chip_gen: v7x
topology: tpu7x:2x2x1
jax: 0.10.0
libtpu: 0.0.40
codegen_flags: <defaults>
</compile_context>

<pallas_src>
import functools

import jax
import jax.numpy as jnp
from jax.experimental import pallas as pl
from jax.experimental.pallas import tpu as pltpu


def lsa_kernel(scale_ref,            # SMEM (1,)   : exp(temperature)
               x_ref,                # VMEM (TB, N, D)
               g_ref, b_ref,         # VMEM (1, D) : LayerNorm gamma / beta
               wqkv_ref,             # VMEM (D, 3*inner) : lane-dense QKV weight
               wout_ref,             # VMEM (inner, D)   : lane-dense output weight
               bout_ref,             # VMEM (1, D)
               o_ref,                # VMEM (TB, N, D)
               *, heads, dim_head, compute_dtype):
    TB, N, D = x_ref.shape
    TBN = TB * N
    dh = dim_head
    inner = heads * dh
    f32 = jnp.float32
    use_approx = jnp.dtype(compute_dtype) != jnp.dtype(f32)

    # ---- LayerNorm (eps = 1e-5, biased variance, elementwise affine), f32 ----
    x = x_ref[...].reshape(TBN, D)                       # leading-dim merge (trivial)
    mean = jnp.mean(x, axis=-1, keepdims=True)
    var = jnp.mean((x - mean) ** 2, axis=-1, keepdims=True)
    xn = (x - mean) * jax.lax.rsqrt(var + 1e-5)
    xn = xn * g_ref[...] + b_ref[...]                    # (TBN, D)

    # ---- Fused QKV projection: ONE lane-dense matmul, f32 accumulation ----
    qkv = jnp.dot(xn.astype(compute_dtype), wqkv_ref[...],
                  preferred_element_type=f32)            # (TBN, 3*inner) f32

    # ---- Head split -> (TB*heads, N, dh) batched form.
    # Lane slices + major-dim stack: relayout-only work (XLU slot), no matmuls.
    def to_heads(off):
        parts = [qkv[:, off + h * dh: off + (h + 1) * dh].reshape(TB, 1, N, dh)
                 for h in range(heads)]
        return jnp.concatenate(parts, axis=1).reshape(TB * heads, N, dh)

    q = to_heads(0)
    k = to_heads(inner)
    v = to_heads(2 * inner)

    # ---- Attention with diagonal (self) mask, batched over (batch, head) ----
    scale = scale_ref[0]
    dots = jax.lax.dot_general(
        q.astype(compute_dtype), k.astype(compute_dtype),
        dimension_numbers=(((2,), (2,)), ((0,), (0,))),  # contract dh, no transpose
        preferred_element_type=f32) * scale              # (TB*heads, N, N)

    eye = (jax.lax.broadcasted_iota(jnp.int32, (N, N), 0) ==
           jax.lax.broadcasted_iota(jnp.int32, (N, N), 1))
    dots = jnp.where(eye[None], -1e30, dots)             # finite mask value
    dots = dots - jnp.max(dots, axis=-1, keepdims=True)  # keep paired with the mask
    e = jnp.exp(dots)                                    # f32 exp (v5e-safe)
    attn = e * pl.reciprocal(jnp.sum(e, axis=-1, keepdims=True), approx=use_approx)

    ctx = jax.lax.dot_general(
        attn.astype(compute_dtype), v.astype(compute_dtype),
        dimension_numbers=(((2,), (1,)), ((0,), (0,))),
        preferred_element_type=f32)                      # (TB*heads, N, dh)

    # ---- Merge heads back into lanes: (TB*heads, N, dh) -> (TBN, inner) ----
    ctx4 = ctx.reshape(TB, heads, N, dh)                 # leading split (trivial)
    ctx = jnp.concatenate(
        [ctx4[:, h].reshape(TBN, dh) for h in range(heads)], axis=-1)  # (TBN, inner)

    # ---- Fused output projection: ONE K = inner lane-dense matmul + bias ----
    out = jnp.dot(ctx.astype(compute_dtype), wout_ref[...],
                  preferred_element_type=f32) + bout_ref[...]          # (TBN, D)
    o_ref[...] = out.reshape(TB, N, D).astype(o_ref.dtype)


def lsa_forward(x, params, *, heads, dim_head, target_rows=256,
                compute_dtype=jnp.bfloat16):
    """x: (B, N, D) float32.  params: dict of module parameters (f32)."""
    B, N, D = x.shape
    assert N % 8 == 0, "sequence length must be a multiple of 8 (sublane tile)"
    inner = heads * dim_head

    # Choose TB so TB*N reaches the MXU row target (256 -> good on v6e/v7x, >=128 on
    # v5e). For small batches this runs everything in a single grid step.
    TB = min(B, max(1, -(-target_rows // N)))
    # Pad B up to a multiple of TB (never shrink TB for odd / prime B).
    n_blocks = -(-B // TB)
    B_pad = n_blocks * TB
    if B_pad != B:
        x = jnp.pad(x, ((0, B_pad - B), (0, 0), (0, 0)))

    # Lane-dense weights in their natural layout; cast once on the wrapper side.
    w_qkv = params["w_qkv"].astype(compute_dtype)        # (D, 3*inner)
    w_out = params["w_out"].astype(compute_dtype)        # (inner, D)
    scale = jnp.exp(params["temperature"]).astype(jnp.float32)   # (1,) SMEM scalar

    kernel = functools.partial(lsa_kernel, heads=heads, dim_head=dim_head,
                               compute_dtype=compute_dtype)

    out = pl.pallas_call(
        kernel,
        out_shape=jax.ShapeDtypeStruct((B_pad, N, D), jnp.float32),
        grid=(n_blocks,),
        in_specs=[
            pl.BlockSpec(memory_space=pltpu.MemorySpace.SMEM),         # scale
            pl.BlockSpec((TB, N, D), lambda b: (b, 0, 0)),             # x
            pl.BlockSpec((1, D), lambda b: (0, 0)),                    # ln gamma
            pl.BlockSpec((1, D), lambda b: (0, 0)),                    # ln beta
            pl.BlockSpec((D, 3 * inner), lambda b: (0, 0)),            # w_qkv
            pl.BlockSpec((inner, D), lambda b: (0, 0)),                # w_out
            pl.BlockSpec((1, D), lambda b: (0, 0)),                    # b_out
        ],
        out_specs=pl.BlockSpec((TB, N, D), lambda b: (b, 0, 0)),
        compiler_params=pltpu.CompilerParams(
            dimension_semantics=("parallel",),
            # KB-scale blocks: far under every generation's VMEM (incl. v7x 64 MiB).
            vmem_limit_bytes=32 * 1024 * 1024),
    )(scale, x, params["ln_gamma"], params["ln_beta"], w_qkv, w_out,
      params["b_out"])
    return out[:B]


def lsa_reference(x, params, *, heads, dim_head):
    """Pure-JAX reference mirroring the PyTorch forward."""
    inner = heads * dim_head
    mean = jnp.mean(x, axis=-1, keepdims=True)
    var = jnp.mean((x - mean) ** 2, axis=-1, keepdims=True)
    xn = (x - mean) / jnp.sqrt(var + 1e-5)
    xn = xn * params["ln_gamma"][0] + params["ln_beta"][0]

    qkv = xn @ params["w_qkv"]                                        # (B, N, 3*inner)
    q, k, v = jnp.split(qkv, 3, axis=-1)

    def to_heads(t):
        B, N, _ = t.shape
        return t.reshape(B, N, heads, dim_head).transpose(0, 2, 1, 3)  # (B, H, N, dh)

    q, k, v = map(to_heads, (q, k, v))
    scale = jnp.exp(params["temperature"][0])
    dots = jnp.einsum("bhnd,bhmd->bhnm", q, k) * scale
    n = dots.shape[-1]
    dots = jnp.where(jnp.eye(n, dtype=bool), -jnp.finfo(jnp.float32).max, dots)
    attn = jax.nn.softmax(dots, axis=-1)
    out = jnp.einsum("bhnm,bhmd->bhnd", attn, v)
    out = out.transpose(0, 2, 1, 3).reshape(x.shape[0], x.shape[1], inner)
    return out @ params["w_out"] + params["b_out"][0]


if __name__ == "__main__":
    # Small but lane-dense shapes: D and inner multiples of 128, N multiple of 8.
    B, N, D = 4, 16, 128
    heads, dim_head = 4, 32
    inner = heads * dim_head

    key = jax.random.PRNGKey(0)
    k_x, k_qkv, k_out, k_bout, k_g, k_b = jax.random.split(key, 6)

    x = jax.random.normal(k_x, (B, N, D), dtype=jnp.float32)
    params = {
        # nn.Parameter(log(dim_head ** -0.5))
        "temperature": jnp.array([jnp.log(dim_head ** (-0.5))], dtype=jnp.float32),
        "ln_gamma": (1.0 + 0.1 * jax.random.normal(k_g, (1, D))).astype(jnp.float32),
        "ln_beta": (0.1 * jax.random.normal(k_b, (1, D))).astype(jnp.float32),
        # Linear weights stored as (in, out) so forward does x @ W.
        "w_qkv": (0.05 * jax.random.normal(k_qkv, (D, 3 * inner))).astype(jnp.float32),
        "w_out": (0.05 * jax.random.normal(k_out, (inner, D))).astype(jnp.float32),
        "b_out": (0.05 * jax.random.normal(k_bout, (1, D))).astype(jnp.float32),
    }

    y_ref = lsa_reference(x, params, heads=heads, dim_head=dim_head)

    # Strict numerics check: f32 compute path must match the pure-JAX reference.
    y32 = lsa_forward(x, params, heads=heads, dim_head=dim_head,
                      compute_dtype=jnp.float32)
    y32 = jax.block_until_ready(y32)
    assert y32.shape == (B, N, D)
    assert jnp.allclose(y32, y_ref, atol=2e-4, rtol=2e-4), "f32 kernel mismatch"

    # Performance path: bf16 MXU operands, f32 accumulation (looser tolerance).
    ybf = lsa_forward(x, params, heads=heads, dim_head=dim_head,
                      compute_dtype=jnp.bfloat16)
    ybf = jax.block_until_ready(ybf)
    assert jnp.allclose(ybf, y_ref, atol=5e-2, rtol=5e-2), "bf16 kernel mismatch"

    print("KERNEL_OK")
</pallas_src>

<mosaic_0001>
module attributes {stable_mosaic.version = 11 : i64} {
  func.func @lsa_kernel(%arg0: i32, %arg1: memref<1xf32, #tpu.memory_space<smem>>, %arg2: memref<4x16x128xf32, #tpu.memory_space<vmem>>, %arg3: memref<1x128xf32, #tpu.memory_space<vmem>>, %arg4: memref<1x128xf32, #tpu.memory_space<vmem>>, %arg5: memref<128x384xf32, #tpu.memory_space<vmem>>, %arg6: memref<128x128xf32, #tpu.memory_space<vmem>>, %arg7: memref<1x128xf32, #tpu.memory_space<vmem>>, %arg8: memref<4x16x128xf32, #tpu.memory_space<vmem>>) attributes {dimension_semantics = [#tpu.dimension_semantics<parallel>], iteration_bounds = array<i64: 1>, scalar_prefetch = 0 : i64, scratch_operands = 0 : i64, tpu.core_type = #tpu.core_type<tc>, window_params = [{transform_indices = @transform_0, window_bounds = array<i64: 1>}, {transform_indices = @transform_1, window_bounds = array<i64: 4, 16, 128>}, {pipeline_mode = #tpu.pipeline_mode<synchronous>, transform_indices = @transform_2, window_bounds = array<i64: 1, 128>}, {pipeline_mode = #tpu.pipeline_mode<synchronous>, transform_indices = @transform_3, window_bounds = array<i64: 1, 128>}, {pipeline_mode = #tpu.pipeline_mode<synchronous>, transform_indices = @transform_4, window_bounds = array<i64: 128, 384>}, {pipeline_mode = #tpu.pipeline_mode<synchronous>, transform_indices = @transform_5, window_bounds = array<i64: 128, 128>}, {pipeline_mode = #tpu.pipeline_mode<synchronous>, transform_indices = @transform_6, window_bounds = array<i64: 1, 128>}, {transform_indices = @transform_7, window_bounds = array<i64: 4, 16, 128>}]} {
    %c0 = arith.constant 0 : index
    %c0_0 = arith.constant 0 : index
    %c0_1 = arith.constant 0 : index
    %0 = vector.load %arg2[%c0, %c0_0, %c0_1] : memref<4x16x128xf32, #tpu.memory_space<vmem>>, vector<4x16x128xf32>
    %1 = vector.shape_cast %0 : vector<4x16x128xf32> to vector<64x128xf32>
    %cst = arith.constant dense<0.000000e+00> : vector<64xf32>
    %2 = vector.multi_reduction <add>, %1, %cst [1] : vector<64x128xf32> to vector<64xf32>
    %3 = vector.shape_cast %2 : vector<64xf32> to vector<64x1xf32>
    %cst_2 = arith.constant 1.280000e+02 : f32
    %4 = vector.broadcast %cst_2 : f32 to vector<64x1xf32>
    %5 = arith.divf %3, %4 : vector<64x1xf32>
    %6 = vector.broadcast %5 : vector<64x1xf32> to vector<64x128xf32>
    %7 = arith.subf %1, %6 : vector<64x128xf32>
    %8 = arith.mulf %7, %7 : vector<64x128xf32>
    %cst_3 = arith.constant dense<0.000000e+00> : vector<64xf32>
    %9 = vector.multi_reduction <add>, %8, %cst_3 [1] : vector<64x128xf32> to vector<64xf32>
    %10 = vector.shape_cast %9 : vector<64xf32> to vector<64x1xf32>
    %cst_4 = arith.constant 1.280000e+02 : f32
    %11 = vector.broadcast %cst_4 : f32 to vector<64x1xf32>
    %12 = arith.divf %10, %11 : vector<64x1xf32>
    %13 = vector.broadcast %5 : vector<64x1xf32> to vector<64x128xf32>
    %14 = arith.subf %1, %13 : vector<64x128xf32>
    %cst_5 = arith.constant 9.99999974E-6 : f32
    %15 = vector.broadcast %cst_5 : f32 to vector<64x1xf32>
    %16 = arith.addf %12, %15 : vector<64x1xf32>
    %17 = math.rsqrt %16 : vector<64x1xf32>
    %18 = vector.broadcast %17 : vector<64x1xf32> to vector<64x128xf32>
    %19 = arith.mulf %14, %18 : vector<64x128xf32>
    %c0_6 = arith.constant 0 : index
    %c0_7 = arith.constant 0 : index
    %20 = vector.load %arg3[%c0_6, %c0_7] : memref<1x128xf32, #tpu.memory_space<vmem>>, vector<1x128xf32>
    %21 = vector.broadcast %20 : vector<1x128xf32> to vector<64x128xf32>
    %22 = arith.mulf %19, %21 : vector<64x128xf32>
    %c0_8 = arith.constant 0 : index
    %c0_9 = arith.constant 0 : index
    %23 = vector.load %arg4[%c0_8, %c0_9] : memref<1x128xf32, #tpu.memory_space<vmem>>, vector<1x128xf32>
    %24 = vector.broadcast %23 : vector<1x128xf32> to vector<64x128xf32>
    %25 = arith.addf %22, %24 : vector<64x128xf32>
    %c0_10 = arith.constant 0 : index
    %c0_11 = arith.constant 0 : index
    %26 = vector.load %arg5[%c0_10, %c0_11] : memref<128x384xf32, #tpu.memory_space<vmem>>, vector<128x384xf32>
    %cst_12 = arith.constant dense<0.000000e+00> : vector<64x384xf32>
    %27 = tpu.matmul %25, %26, %cst_12 {dimension_numbers = #tpu.dot_dimension_numbers<[1], [0], [0], [1], [0, 0, 1, 1], [], []>} : vector<64x128xf32>, vector<128x384xf32>, vector<64x384xf32> -> vector<64x384xf32>
    %28 = vector.extract_strided_slice %27 {offsets = [0, 0], sizes = [64, 32], strides = [1, 1]} : vector<64x384xf32> to vector<64x32xf32>
    %29 = vector.shape_cast %28 : vector<64x32xf32> to vector<4x1x16x32xf32>
    %30 = vector.extract_strided_slice %27 {offsets = [0, 32], sizes = [64, 32], strides = [1, 1]} : vector<64x384xf32> to vector<64x32xf32>
    %31 = vector.shape_cast %30 : vector<64x32xf32> to vector<4x1x16x32xf32>
    %32 = vector.extract_strided_slice %27 {offsets = [0, 64], sizes = [64, 32], strides = [1, 1]} : vector<64x384xf32> to vector<64x32xf32>
    %33 = vector.shape_cast %32 : vector<64x32xf32> to vector<4x1x16x32xf32>
    %34 = vector.extract_strided_slice %27 {offsets = [0, 96], sizes = [64, 32], strides = [1, 1]} : vector<64x384xf32> to vector<64x32xf32>
    %35 = vector.shape_cast %34 : vector<64x32xf32> to vector<4x1x16x32xf32>
    %36 = tpu.concatenate %29, %31, %33, %35 in 1 : vector<4x1x16x32xf32>, vector<4x1x16x32xf32>, vector<4x1x16x32xf32>, vector<4x1x16x32xf32> -> vector<4x4x16x32xf32>
    %37 = vector.shape_cast %36 : vector<4x4x16x32xf32> to vector<16x16x32xf32>
    %38 = vector.extract_strided_slice %27 {offsets = [0, 128], sizes = [64, 32], strides = [1, 1]} : vector<64x384xf32> to vector<64x32xf32>
    %39 = vector.shape_cast %38 : vector<64x32xf32> to vector<4x1x16x32xf32>
    %40 = vector.extract_strided_slice %27 {offsets = [0, 160], sizes = [64, 32], strides = [1, 1]} : vector<64x384xf32> to vector<64x32xf32>
    %41 = vector.shape_cast %40 : vector<64x32xf32> to vector<4x1x16x32xf32>
    %42 = vector.extract_strided_slice %27 {offsets = [0, 192], sizes = [64, 32], strides = [1, 1]} : vector<64x384xf32> to vector<64x32xf32>
    %43 = vector.shape_cast %42 : vector<64x32xf32> to vector<4x1x16x32xf32>
    %44 = vector.extract_strided_slice %27 {offsets = [0, 224], sizes = [64, 32], strides = [1, 1]} : vector<64x384xf32> to vector<64x32xf32>
    %45 = vector.shape_cast %44 : vector<64x32xf32> to vector<4x1x16x32xf32>
    %46 = tpu.concatenate %39, %41, %43, %45 in 1 : vector<4x1x16x32xf32>, vector<4x1x16x32xf32>, vector<4x1x16x32xf32>, vector<4x1x16x32xf32> -> vector<4x4x16x32xf32>
    %47 = vector.shape_cast %46 : vector<4x4x16x32xf32> to vector<16x16x32xf32>
    %48 = vector.extract_strided_slice %27 {offsets = [0, 256], sizes = [64, 32], strides = [1, 1]} : vector<64x384xf32> to vector<64x32xf32>
    %49 = vector.shape_cast %48 : vector<64x32xf32> to vector<4x1x16x32xf32>
    %50 = vector.extract_strided_slice %27 {offsets = [0, 288], sizes = [64, 32], strides = [1, 1]} : vector<64x384xf32> to vector<64x32xf32>
    %51 = vector.shape_cast %50 : vector<64x32xf32> to vector<4x1x16x32xf32>
    %52 = vector.extract_strided_slice %27 {offsets = [0, 320], sizes = [64, 32], strides = [1, 1]} : vector<64x384xf32> to vector<64x32xf32>
    %53 = vector.shape_cast %52 : vector<64x32xf32> to vector<4x1x16x32xf32>
    %54 = vector.extract_strided_slice %27 {offsets = [0, 352], sizes = [64, 32], strides = [1, 1]} : vector<64x384xf32> to vector<64x32xf32>
    %55 = vector.shape_cast %54 : vector<64x32xf32> to vector<4x1x16x32xf32>
    %56 = tpu.concatenate %49, %51, %53, %55 in 1 : vector<4x1x16x32xf32>, vector<4x1x16x32xf32>, vector<4x1x16x32xf32>, vector<4x1x16x32xf32> -> vector<4x4x16x32xf32>
    %57 = vector.shape_cast %56 : vector<4x4x16x32xf32> to vector<16x16x32xf32>
    %c0_13 = arith.constant 0 : index
    %58 = memref.load %arg1[%c0_13] : memref<1xf32, #tpu.memory_space<smem>>
    %cst_14 = arith.constant dense<0.000000e+00> : vector<16x16x16xf32>
    %59 = tpu.matmul %37, %47, %cst_14 {dimension_numbers = #tpu.dot_dimension_numbers<[2], [2], [1], [1], [0, 0, 0, 1, 1, 1], [0], [0]>} : vector<16x16x32xf32>, vector<16x16x32xf32>, vector<16x16x16xf32> -> vector<16x16x16xf32>
    %60 = vector.broadcast %58 : f32 to vector<16x16x16xf32>
    %61 = arith.mulf %59, %60 : vector<16x16x16xf32>
    %62 = tpu.iota {dimensions = array<i32: 0>} : vector<16x16xi32>
    %63 = tpu.iota {dimensions = array<i32: 1>} : vector<16x16xi32>
    %64 = arith.cmpi eq, %62, %63 : vector<16x16xi32>
    %65 = vector.shape_cast %64 : vector<16x16xi1> to vector<1x16x16xi1>
    %cst_15 = arith.constant -1.000000e+30 : f32
    %66 = vector.shape_cast %65 : vector<1x16x16xi1> to vector<1x16x16xi1>
    %67 = vector.broadcast %66 : vector<1x16x16xi1> to vector<16x16x16xi1>
    %68 = vector.broadcast %cst_15 : f32 to vector<16x16x16xf32>
    %69 = arith.select %67, %68, %61 : vector<16x16x16xi1>, vector<16x16x16xf32>
    %cst_16 = arith.constant dense<0xFF800000> : vector<16x16xf32>
    %70 = vector.multi_reduction <maximumf>, %69, %cst_16 [2] : vector<16x16x16xf32> to vector<16x16xf32>
    %71 = vector.shape_cast %70 : vector<16x16xf32> to vector<16x16x1xf32>
    %72 = vector.broadcast %71 : vector<16x16x1xf32> to vector<16x16x16xf32>
    %73 = arith.subf %69, %72 : vector<16x16x16xf32>
    %74 = math.exp %73 : vector<16x16x16xf32>
    %cst_17 = arith.constant dense<0.000000e+00> : vector<16x16xf32>
    %75 = vector.multi_reduction <add>, %74, %cst_17 [2] : vector<16x16x16xf32> to vector<16x16xf32>
    %76 = vector.shape_cast %75 : vector<16x16xf32> to vector<16x16x1xf32>
    %77 = tpu.reciprocal %76 : vector<16x16x1xf32> -> vector<16x16x1xf32>
    %78 = vector.broadcast %77 : vector<16x16x1xf32> to vector<16x16x16xf32>
    %79 = arith.mulf %74, %78 : vector<16x16x16xf32>
    %cst_18 = arith.constant dense<0.000000e+00> : vector<16x16x32xf32>
    %80 = tpu.matmul %79, %57, %cst_18 {dimension_numbers = #tpu.dot_dimension_numbers<[2], [1], [1], [2], [0, 0, 0, 1, 1, 2], [0], [0]>} : vector<16x16x16xf32>, vector<16x16x32xf32>, vector<16x16x32xf32> -> vector<16x16x32xf32>
    %81 = vector.shape_cast %80 : vector<16x16x32xf32> to vector<4x4x16x32xf32>
    %82 = vector.extract_strided_slice %81 {offsets = [0, 0, 0, 0], sizes = [4, 1, 16, 32], strides = [1, 1, 1, 1]} : vector<4x4x16x32xf32> to vector<4x1x16x32xf32>
    %83 = vector.shape_cast %82 : vector<4x1x16x32xf32> to vector<4x16x32xf32>
    %84 = vector.shape_cast %83 : vector<4x16x32xf32> to vector<64x32xf32>
    %85 = vector.extract_strided_slice %81 {offsets = [0, 1, 0, 0], sizes = [4, 1, 16, 32], strides = [1, 1, 1, 1]} : vector<4x4x16x32xf32> to vector<4x1x16x32xf32>
    %86 = vector.shape_cast %85 : vector<4x1x16x32xf32> to vector<4x16x32xf32>
    %87 = vector.shape_cast %86 : vector<4x16x32xf32> to vector<64x32xf32>
    %88 = vector.extract_strided_slice %81 {offsets = [0, 2, 0, 0], sizes = [4, 1, 16, 32], strides = [1, 1, 1, 1]} : vector<4x4x16x32xf32> to vector<4x1x16x32xf32>
    %89 = vector.shape_cast %88 : vector<4x1x16x32xf32> to vector<4x16x32xf32>
    %90 = vector.shape_cast %89 : vector<4x16x32xf32> to vector<64x32xf32>
    %91 = vector.extract_strided_slice %81 {offsets = [0, 3, 0, 0], sizes = [4, 1, 16, 32], strides = [1, 1, 1, 1]} : vector<4x4x16x32xf32> to vector<4x1x16x32xf32>
    %92 = vector.shape_cast %91 : vector<4x1x16x32xf32> to vector<4x16x32xf32>
    %93 = vector.shape_cast %92 : vector<4x16x32xf32> to vector<64x32xf32>
    %94 = tpu.concatenate %84, %87, %90, %93 in 1 : vector<64x32xf32>, vector<64x32xf32>, vector<64x32xf32>, vector<64x32xf32> -> vector<64x128xf32>
    %c0_19 = arith.constant 0 : index
    %c0_20 = arith.constant 0 : index
    %95 = vector.load %arg6[%c0_19, %c0_20] : memref<128x128xf32, #tpu.memory_space<vmem>>, vector<128x128xf32>
    %cst_21 = arith.constant dense<0.000000e+00> : vector<64x128xf32>
    %96 = tpu.matmul %94, %95, %cst_21 {dimension_numbers = #tpu.dot_dimension_numbers<[1], [0], [0], [1], [0, 0, 1, 1], [], []>} : vector<64x128xf32>, vector<128x128xf32>, vector<64x128xf32> -> vector<64x128xf32>
    %c0_22 = arith.constant 0 : index
    %c0_23 = arith.constant 0 : index
    %97 = vector.load %arg7[%c0_22, %c0_23] : memref<1x128xf32, #tpu.memory_space<vmem>>, vector<1x128xf32>
    %98 = vector.broadcast %97 : vector<1x128xf32> to vector<64x128xf32>
    %99 = arith.addf %96, %98 : vector<64x128xf32>
    %100 = vector.shape_cast %99 : vector<64x128xf32> to vector<4x16x128xf32>
    %c0_24 = arith.constant 0 : index
    %c0_25 = arith.constant 0 : index
    %c0_26 = arith.constant 0 : index
    %101 = vector.load %arg8[%c0_24, %c0_25, %c0_26] : memref<4x16x128xf32, #tpu.memory_space<vmem>>, vector<4x16x128xf32>
    tpu.vector_store %arg8[%c0_24, %c0_25, %c0_26], %100 {strides = array<i32>} : memref<4x16x128xf32, #tpu.memory_space<vmem>>, vector<4x16x128xf32>,
    return
  }
  func.func @transform_0(%arg0: i32) -> i32 {
    %c0_i32 = arith.constant 0 : i32
    %c0_i32_0 = arith.constant 0 : i32
    return %c0_i32 : i32
  }
  func.func @transform_1(%arg0: i32) -> (i32, i32, i32) {
    %c0_i32 = arith.constant 0 : i32
    %c0_i32_0 = arith.constant 0 : i32
    %c0_i32_1 = arith.constant 0 : i32
    return %arg0, %c0_i32, %c0_i32_0 : i32, i32, i32
  }
  func.func @transform_2(%arg0: i32) -> (i32, i32) {
    %c0_i32 = arith.constant 0 : i32
    %c0_i32_0 = arith.constant 0 : i32
    %c0_i32_1 = arith.constant 0 : i32
    return %c0_i32, %c0_i32_0 : i32, i32
  }
  func.func @transform_3(%arg0: i32) -> (i32, i32) {
    %c0_i32 = arith.constant 0 : i32
    %c0_i32_0 = arith.constant 0 : i32
    %c0_i32_1 = arith.constant 0 : i32
    return %c0_i32, %c0_i32_0 : i32, i32
  }
  func.func @transform_4(%arg0: i32) -> (i32, i32) {
    %c0_i32 = arith.constant 0 : i32
    %c0_i32_0 = arith.constant 0 : i32
    %c0_i32_1 = arith.constant 0 : i32
    return %c0_i32, %c0_i32_0 : i32, i32
  }
  func.func @transform_5(%arg0: i32) -> (i32, i32) {
    %c0_i32 = arith.constant 0 : i32
    %c0_i32_0 = arith.constant 0 : i32
    %c0_i32_1 = arith.constant 0 : i32
    return %c0_i32, %c0_i32_0 : i32, i32
  }
  func.func @transform_6(%arg0: i32) -> (i32, i32) {
    %c0_i32 = arith.constant 0 : i32
    %c0_i32_0 = arith.constant 0 : i32
    %c0_i32_1 = arith.constant 0 : i32
    return %c0_i32, %c0_i32_0 : i32, i32
  }
  func.func @transform_7(%arg0: i32) -> (i32, i32, i32) {
    %c0_i32 = arith.constant 0 : i32
    %c0_i32_0 = arith.constant 0 : i32
    %c0_i32_1 = arith.constant 0 : i32
    return %arg0, %c0_i32, %c0_i32_0 : i32, i32, i32
  }
}

</mosaic_0001>

<bundles_post_ra>
// kernel: tpu_custom_call.1
= control target key start
LH: loop header
LB: loop body
LE: loop exit
PB: predicated region body
PF: predicated region fallthrough
CT: control target
= control target key end

     0   :  { %13 = vsyncpa [#allocation4], 0  ;;  %s6315_s0 = inlined_call_operand.<no memory space> [shape: f32[1], index: 0, kind: input, shape index: {}]   ;;  %s6316_s1 = inlined_call_operand.hbm [shape: f32[4,16,128], index: 1, kind: input, shape index: {}]   ;;  %s6317_s2 = inlined_call_operand.vmem [shape: f32[1,128], index: 2, kind: input, shape index: {}]   ;;  %s6318_s3 = inlined_call_operand.vmem [shape: f32[1,128], index: 3, kind: input, shape index: {}]   ;;  %s6319_s4 = inlined_call_operand.hbm [shape: f32[128,384], index: 4, kind: input, shape index: {}]   ;;  %s6320_s5 = inlined_call_operand.hbm [shape: f32[128,128], index: 5, kind: input, shape index: {}]   ;;  %s6321_s6 = inlined_call_operand.vmem [shape: f32[1,128], index: 6, kind: input, shape index: {}]   ;;  %s6322_s7 = inlined_call_operand.hbm [shape: f32[4,16,128], index: 7, kind: output, shape index: {}]  }
   0x1   :  { %14 = vsyncpa [#allocation7], 0 }
   0x2   :  { %15 = vsyncpa [#allocation5], 0  ;;  %s5274_s24 = smov [#allocation6]   ;;  %s5180_s28 = scalar_lea.hbm %s6319_s4, 6144 }
   0x3   :  { %s39_s25 = sshll.u32 %s5274_s24, 4  ;;  %p5181_p0 = scmp.ne.s32.totalorder %s6319_s4, %s5180_s28  ;;  %s40_s25 = int_to_ptr.vmem [resolvable:$true] %s39_s25 }
   0x4   :  { %p5184_p1 = scmp.lt.u32.totalorder %s5180_s28, %s6319_s4 }
   0x6   :  { %p5186_p2 = pnand %p5184_p1, %p5181_p0 }
   0x8   :  { %5189 = shalt.err (!%p5186_p2)
}
   0x9   :  { %s5190_s10 = scalar_lea.vmem %s40_s25, 6144  ;;  %p5195_p4 = scmp.lt.s32.totalorder %s40_s25, %s40_s25 }
   0xa   :  { %p5191_p3 = scmp.ne.s32.totalorder %s40_s25, %s5190_s10  ;;  %p5196_p5 = scmp.lt.s32.totalorder %s5190_s10, %s5190_s10 }
   0xc   :  { %p5197_p6 = por %p5196_p5, %p5195_p4 }
   0xe   :  { %p5198_p7 = pnand %p5197_p6, %p5191_p3 }
  0x10   :  { %5201 = shalt.err (!%p5198_p7)
}
  0x11   :  { %s5275_s11 = smov 384   ;;  %s5276_s12 = smov 24  }
  0x12   :  { %45 = dma.hbm_to_vmem [thread:$0]  %s6319_s4, 6144, %s40_s25, [#allocation7], %s5275_s11, %s5275_s11, %s5276_s12  }
  0x13   :  { %s5277_s15 = smov [#allocation3]   ;;  %s5202_s19 = scalar_lea.hbm %s6316_s1, 1024 }
  0x14   :  { %s23_s16 = sshll.u32 %s5277_s15, 4  ;;  %p5203_p8 = scmp.ne.s32.totalorder %s6316_s1, %s5202_s19  ;;  %s24_s16 = int_to_ptr.vmem [resolvable:$true] %s23_s16 }
  0x15   :  { %p5206_p9 = scmp.lt.u32.totalorder %s5202_s19, %s6316_s1 }
  0x17   :  { %p5208_p10 = pnand %p5206_p9, %p5203_p8 }
  0x19   :  { %5211 = shalt.err (!%p5208_p10)
}
  0x1a   :  { %s5212_s24 = scalar_lea.vmem %s24_s16, 1024  ;;  %p5217_p12 = scmp.lt.s32.totalorder %s24_s16, %s24_s16 }
  0x1b   :  { %p5213_p11 = scmp.ne.s32.totalorder %s24_s16, %s5212_s24  ;;  %p5218_p13 = scmp.lt.s32.totalorder %s5212_s24, %s5212_s24 }
  0x1d   :  { %p5219_p0 = por %p5218_p13, %p5217_p12 }
  0x1f   :  { %p5220_p1 = pnand %p5219_p0, %p5213_p11 }
  0x21   :  { %5223 = shalt.err (!%p5220_p1)
}
  0x22   :  { %s5278_s4 = smov 128   ;;  %s5279_s25 = smov 8  }
  0x23   :  { %29 = dma.hbm_to_vmem [thread:$0]  %s6316_s1, 1024, %s24_s16, [#allocation4], %s5278_s4, %s5278_s4, %s5279_s25  }
  0x24   :  { %s5280_s28 = smov [#allocation8]   ;;  %s5224_s9 = scalar_lea.hbm %s6320_s5, 2048 }
  0x25   :  { %s51_s29 = sshll.u32 %s5280_s28, 4  ;;  %p5225_p2 = scmp.ne.s32.totalorder %s6320_s5, %s5224_s9  ;;  %s52_s29 = int_to_ptr.vmem [resolvable:$true] %s51_s29 }
  0x26   :  { %p5228_p3 = scmp.lt.u32.totalorder %s5224_s9, %s6320_s5 }
  0x28   :  { %p5230_p4 = pnand %p5228_p3, %p5225_p2 }
  0x2a   :  { %5233 = shalt.err (!%p5230_p4)
}
  0x2b   :  { %s5234_s14 = scalar_lea.vmem %s52_s29, 2048  ;;  %p5239_p6 = scmp.lt.s32.totalorder %s52_s29, %s52_s29 }
  0x2c   :  { %p5235_p5 = scmp.ne.s32.totalorder %s52_s29, %s5234_s14  ;;  %p5240_p7 = scmp.lt.s32.totalorder %s5234_s14, %s5234_s14 }
  0x2e   :  { %p5241_p8 = por %p5240_p7, %p5239_p6 }
  0x30   :  { %p5242_p9 = pnand %p5241_p8, %p5235_p5 }
  0x32   :  { %5245 = shalt.err (!%p5242_p9)
}
  0x33   :  { %57 = dma.hbm_to_vmem [thread:$0]  %s6320_s5, 2048, %s52_s29, [#allocation7], %s5278_s4, %s5278_s4, %s5279_s25  }
  0x34   :  { %5268 = dma.done.wait [#allocation4], 1024  }
  0x35   :  { %5269 = vsyncadd [#allocation4], 4294966272 }
  0x36   :  { %5270 = dma.done.wait [#allocation7], 8192  }
  0x37   :  { %5271 = vsyncadd [#allocation7], 4294959104  ;;  %v69_v0 = vld [vmem:[#allocation3] sm:$0xff]  ;;  %v71_v1 = vld [vmem:[#allocation3 + $0x10] sm:$0xff]  ;;  %vm655_vm0 = vcmask 261120   ;;  %s5284_s19 = smov 32  }
  0x38   :  { %77 = vadd.xlane.f32.xlu0 %v69_v0  ;;  %81 = vadd.xlane.f32.xlu1 %v71_v1  ;;  %v70_v2 = vld [vmem:[#allocation3 + $0x8] sm:$0xff]  ;;  %v72_v3 = vld [vmem:[#allocation3 + $0x18] sm:$0xff]  ;;  %v5368_v4 = vld [vmem:[#allocation3 + $0x20] sm:$0xff]  ;;  %vm2060_vm3 = vcmask 130048   ;;  %vm3813_vm5 = vcmask 523264   ;;  %vm3822_vm6 = vcmask 785408  }
  0x39   :  { %v5370_v5 = vld [vmem:[#allocation3 + $0x28] sm:$0xff]  ;;  %v5374_v6 = vld [vmem:[#allocation3 + $0x30] sm:$0xff]  ;;  %v5376_v7 = vld [vmem:[#allocation3 + $0x38] sm:$0xff]  ;;  %s5285_s23 = smov [#allocation9]  }
  0x3a   :  { %v197_v8 = vld [vmem:[#allocation6 + $0x8] sm:$0xff]  ;;  %v200_v9 = vld [vmem:[#allocation6 + $0x20] sm:$0xff]  ;;  %v199_v12 = vld [vmem:[#allocation6 + $0x18] sm:$0xff] }
  0x3b   :  { %v196_v10 = vld [vmem:[#allocation6] sm:$0xff]  ;;  %v4572_v11 = vpack.c.bf16 %v200_v9, %v197_v8  ;;  %v203_v13 = vld [vmem:[#allocation6 + $0x38] sm:$0xff]  ;;  %v206_v14 = vld [vmem:[#allocation6 + $0x50] sm:$0xff] }
  0x3c   :  { %79 = vadd.xlane.f32.xlu0 %v70_v2  ;;  %83 = vadd.xlane.f32.xlu1 %v72_v3  ;;  %v4574_v15 = vpack.c.bf16 %v199_v12, %v196_v10  ;;  %v4576_v16 = vpack.c.bf16 %v206_v14, %v203_v13  ;;  %v198_v17 = vld [vmem:[#allocation6 + $0x10] sm:$0xff]  ;;  %v201_v18 = vld [vmem:[#allocation6 + $0x28] sm:$0xff]  ;;  %v212_v23 = vld [vmem:[#allocation6 + $0x80] sm:$0xff] }
  0x3d   :  { %v202_v19 = vld [vmem:[#allocation6 + $0x30] sm:$0xff]  ;;  %4573 = vmatprep.subr.bf16.mxu1 %v4572_v11  ;;  %v5380_v20 = vpack.c.bf16 %v201_v18, %v198_v17  ;;  %v205_v21 = vld [vmem:[#allocation6 + $0x48] sm:$0xff]  ;;  %v204_v25 = vld [vmem:[#allocation6 + $0x40] sm:$0xff] }
  0x3e   :  { %v209_v22 = vld [vmem:[#allocation6 + $0x68] sm:$0xff]  ;;  %4575 = vmatpush1.bf16.msra.mxu1 %v4574_v15  ;;  %v4578_v24 = vpack.c.bf16 %v205_v21, %v202_v19  ;;  %v207_v26 = vld [vmem:[#allocation6 + $0x58] sm:$0xff]  ;;  %v208_v29 = vld [vmem:[#allocation6 + $0x60] sm:$0xff] }
  0x3f   :  { %4577 = vmatprep.subr.bf16.mxu1 %v4576_v16  ;;  %4605 = vmatprep.subr.bf16.mxu0 %v5380_v20  ;;  %v4580_v27 = vpack.c.bf16 %v212_v23, %v209_v22  ;;  %v5383_v28 = vpack.c.bf16 %v207_v26, %v204_v25  ;;  %v211_v30 = vld [vmem:[#allocation6 + $0x78] sm:$0xff]  ;;  %v217_v8 = vld [vmem:[#allocation6 + $0xa8] sm:$0xff]  ;;  %v224_v10 = vld [vmem:[#allocation6 + $0xe0] sm:$0xff] }
  0x40   :  { %85 = vadd.xlane.f32.xlu0 %v5368_v4  ;;  %87 = vadd.xlane.f32.xlu1 %v5370_v5  ;;  %v4582_v31 = vpack.c.bf16 %v211_v30, %v208_v29  ;;  %v216_v11 = vld [vmem:[#allocation6 + $0xa0] sm:$0xff]  ;;  %v219_v13 = vld [vmem:[#allocation6 + $0xb8] sm:$0xff]  ;;  %v230_v19 = vld [vmem:[#allocation6 + $0x110] sm:$0xff] }
  0x41   :  { %4607 = vmatpush3.bf16.msra.mxu0 %v5380_v20  ;;  %v220_v14 = vld [vmem:[#allocation6 + $0xc0] sm:$0xff]  ;;  %v223_v15 = vld [vmem:[#allocation6 + $0xd8] sm:$0xff]  ;;  %v5428_v16 = vpack.c.bf16 %v219_v13, %v216_v11  ;;  %v222_v21 = vld [vmem:[#allocation6 + $0xd0] sm:$0xff] }
  0x42   :  { %4609 = vmatprep.subr.bf16.mxu0 %v5383_v28  ;;  %4579 = vmatpush1.bf16.msra.mxu1 %v4578_v24  ;;  %v4590_v17 = vpack.c.bf16 %v223_v15, %v220_v14  ;;  %v227_v18 = vld [vmem:[#allocation6 + $0xf8] sm:$0xff]  ;;  %v225_v23 = vld [vmem:[#allocation6 + $0xe8] sm:$0xff]  ;;  %v226_v24 = vld [vmem:[#allocation6 + $0xf0] sm:$0xff] }
  0x43   :  { %4581 = vmatprep.subr.bf16.mxu1 %v4580_v27  ;;  %v4592_v22 = vpack.c.bf16 %v230_v19, %v227_v18  ;;  %v229_v25 = vld [vmem:[#allocation6 + $0x108] sm:$0xff]  ;;  %v5432_v26 = vpack.c.bf16 %v225_v23, %v222_v21  ;;  %v236_v30 = vld [vmem:[#allocation6 + $0x140] sm:$0xff]  ;;  %vm5511_vm1 = vmpackc.low %vm655_vm0, %vm655_vm0 }
  0x44   :  { %89 = vadd.xlane.f32.xlu0 %v5374_v6  ;;  %91 = vadd.xlane.f32.xlu1 %v5376_v7  ;;  %v4594_v27 = vpack.c.bf16 %v229_v25, %v226_v24  ;;  %v233_v29 = vld [vmem:[#allocation6 + $0x128] sm:$0xff]  ;;  %v5453_v18 = vld [vmem:[%s6317_s2] ss:$0 sm:$0xff]  ;;  %s5282_s2 = smov 96  }
  0x45   :  { %4611 = vmatpush3.bf16.msra.mxu0 %v5383_v28 }
  0x46   :  { %4583 = vmatpush1.bf16.msra.mxu1 %v4582_v31  ;;  %v228_v31 = vld [vmem:[#allocation6 + $0x100] sm:$0xff] }
  0xc5   :  { %v78_v32 = vpop.xlane.xlu0 %77  ;;  %v82_v33 = vpop.xlane.xlu1 %81 }
  0xc6   :  { %v94_v34 = vmul.f32 0.0078125, %v78_v32  ;;  %v96_v35 = vmul.f32 0.0078125, %v82_v33  ;;  %v4596_v32 = vpack.c.bf16 %v236_v30, %v233_v29  ;;  %v231_v33 = vld [vmem:[#allocation6 + $0x118] sm:$0xff] }
  0xc8   :  { %v5388_v36 = vsub.f32 %v69_v0, %v94_v34  ;;  %v5390_v37 = vsub.f32 %v71_v1, %v96_v35  ;;  %v215_v0 = vld [vmem:[#allocation6 + $0x98] sm:$0xff]  ;;  %v218_v1 = vld [vmem:[#allocation6 + $0xb0] sm:$0xff]  ;;  %v232_v34 = vld [vmem:[#allocation6 + $0x120] sm:$0xff] }
  0xc9   :  { %v80_v38 = vpop.xlane.xlu0 %79  ;;  %v84_v39 = vpop.xlane.xlu1 %83  ;;  %v235_v35 = vld [vmem:[#allocation6 + $0x138] sm:$0xff] }
  0xca   :  { %v95_v40 = vmul.f32 0.0078125, %v80_v38  ;;  %v110_v41 = vmul.f32 %v5388_v36, %v5388_v36  ;;  %v97_v42 = vmul.f32 0.0078125, %v84_v39  ;;  %v112_v43 = vmul.f32 %v5390_v37, %v5390_v37 }
  0xcb   :  { %v5436_v38 = vpack.c.bf16 %v231_v33, %v228_v31  ;;  %v4598_v39 = vpack.c.bf16 %v235_v35, %v232_v34 }
  0xcc   :  { %118 = vadd.xlane.f32.xlu0 %v110_v41  ;;  %v5396_v44 = vsub.f32 %v70_v2, %v95_v40  ;;  %v5398_v45 = vsub.f32 %v72_v3, %v97_v42  ;;  %v210_v2 = vld [vmem:[#allocation6 + $0x70] sm:$0xff]  ;;  %v4584_v3 = vpack.c.bf16 %v218_v1, %v215_v0  ;;  %v239_v40 = vld [vmem:[#allocation6 + $0x158] sm:$0xff] }
  0xcd   :  { %v86_v46 = vpop.xlane.xlu0 %85  ;;  %v88_v47 = vpop.xlane.xlu1 %87  ;;  %v242_v41 = vld [vmem:[#allocation6 + $0x170] sm:$0xff] }
  0xce   :  { %v98_v48 = vmul.f32 0.0078125, %v86_v46  ;;  %v111_v49 = vmul.f32 %v5396_v44, %v5396_v44  ;;  %v99_v50 = vmul.f32 0.0078125, %v88_v47  ;;  %v113_v51 = vmul.f32 %v5398_v45, %v5398_v45  ;;  %4585 = vmatprep.subr.bf16.mxu1 %v4584_v3  ;;  %v234_v42 = vld [vmem:[#allocation6 + $0x130] sm:$0xff]  ;;  %v237_v46 = vld [vmem:[#allocation6 + $0x148] sm:$0xff] }
  0xcf   :  { %v238_v47 = vld [vmem:[#allocation6 + $0x150] sm:$0xff] }
  0xd0   :  { %122 = vadd.xlane.f32.xlu0 %v112_v43  ;;  %120 = vadd.xlane.f32.xlu1 %v111_v49  ;;  %v5405_v52 = vsub.f32 %v5368_v4, %v98_v48  ;;  %v5408_v53 = vsub.f32 %v5370_v5, %v99_v50  ;;  %v213_v4 = vld [vmem:[#allocation6 + $0x88] sm:$0xff]  ;;  %v214_v5 = vld [vmem:[#allocation6 + $0x90] sm:$0xff]  ;;  %v4600_v43 = vpack.c.bf16 %v242_v41, %v239_v40 }
  0xd1   :  { %v90_v54 = vpop.xlane.xlu0 %89  ;;  %v92_v55 = vpop.xlane.xlu1 %91  ;;  %v4586_v9 = vpack.c.bf16 %v217_v8, %v214_v5  ;;  %v241_v48 = vld [vmem:[#allocation6 + $0x168] sm:$0xff]  ;;  %v5440_v49 = vpack.c.bf16 %v237_v46, %v234_v42 }
  0xd2   :  { %v100_v56 = vmul.f32 0.0078125, %v90_v54  ;;  %v114_v57 = vmul.f32 %v5405_v52, %v5405_v52  ;;  %v101_v58 = vmul.f32 0.0078125, %v92_v55  ;;  %v115_v59 = vmul.f32 %v5408_v53, %v5408_v53  ;;  %v243_v54 = vld [vmem:[#allocation6 + $0x178] sm:$0xff] }
  0xd3   :  { %4587 = vmatpush1.bf16.msra.mxu1 %v4586_v9  ;;  %v4602_v50 = vpack.c.bf16 %v241_v48, %v238_v47 }
  0xd4   :  { %124 = vadd.xlane.f32.xlu1 %v113_v51  ;;  %126 = vadd.xlane.f32.xlu0 %v114_v57  ;;  %v5415_v60 = vsub.f32 %v5374_v6, %v100_v56  ;;  %v5418_v61 = vsub.f32 %v5376_v7, %v101_v58  ;;  %v5424_v6 = vpack.c.bf16 %v213_v4, %v210_v2  ;;  %v221_v7 = vld [vmem:[#allocation6 + $0xc8] sm:$0xff]  ;;  %v240_v51 = vld [vmem:[#allocation6 + $0x160] sm:$0xff]  ;;  %v5281_v56 = vmov 0.0  }
  0xd5   :  { %v4588_v12 = vpack.c.bf16 %v224_v10, %v221_v7  ;;  %v5445_v55 = vpack.c.bf16 %v243_v54, %v240_v51  ;;  %308 = vmatprep.mubr.f32.mxu1 %v5281_v56 }
  0xd6   :  { %v116_v62 = vmul.f32 %v5415_v60, %v5415_v60  ;;  %v117_v63 = vmul.f32 %v5418_v61, %v5418_v61  ;;  %4613 = vmatprep.subr.bf16.mxu0 %v5424_v6 }
  0xd7   :  { %4615 = vmatpush3.bf16.msra.mxu0 %v5424_v6  ;;  %4589 = vmatprep.subr.bf16.mxu1 %v4588_v12 }
  0xd8   :  { %128 = vadd.xlane.f32.xlu1 %v115_v59  ;;  %130 = vadd.xlane.f32.xlu0 %v116_v62 }
  0xd9   :  { %4617 = vmatprep.subr.bf16.mxu0 %v5428_v16  ;;  %4591 = vmatpush1.bf16.msra.mxu1 %v4590_v17 }
  0xda   :  { %4593 = vmatprep.subr.bf16.mxu1 %v4592_v22  ;;  %v5459_v22 = vld [vmem:[%s6318_s3] ss:$0 sm:$0xff]  ;;  %s5283_s3 = smov 64  }
  0xdb   :  { %4619 = vmatpush3.bf16.msra.mxu0 %v5428_v16 }
  0xdc   :  { %132 = vadd.xlane.f32.xlu1 %v117_v63  ;;  %4621 = vmatprep.subr.bf16.mxu0 %v5432_v26 }
  0xdd   :  { %4595 = vmatpush1.bf16.msra.mxu1 %v4594_v27 }
  0xde   :  { %4597 = vmatprep.subr.bf16.mxu1 %v4596_v32 }
  0xdf   :  { %4623 = vmatpush3.bf16.msra.mxu0 %v5432_v26 }
  0xe0   :  { %4625 = vmatprep.subr.bf16.mxu0 %v5436_v38 }
  0xe1   :  { %4599 = vmatpush1.bf16.msra.mxu1 %v4598_v39 }
  0xe2   :  { %4601 = vmatprep.subr.bf16.mxu1 %v4600_v43 }
  0xe3   :  { %4627 = vmatpush3.bf16.msra.mxu0 %v5436_v38 }
  0xe4   :  { %4629 = vmatprep.subr.bf16.mxu0 %v5440_v49 }
  0xe5   :  { %4603 = vmatpush1.bf16.msra.mxu1 %v4602_v50 }
  0xe6   :  { %4828 = vmatprep.subr.bf16.mxu1 %v5380_v20 }
  0xe7   :  { %4631 = vmatpush3.bf16.msra.mxu0 %v5440_v49 }
  0xe8   :  { %4633 = vmatprep.subr.bf16.mxu0 %v5445_v55 }
  0xeb   :  { %4635 = vmatpush3.bf16.msra.mxu0 %v5445_v55 }
 0x159   :  { %v119_v57 = vpop.xlane.xlu0 %118 }
 0x15a   :  { %v134_v58 = vmul.f32 0.0078125, %v119_v57 }
 0x15c   :  { %v142_v59 = vadd.f32 1e-05, %v134_v58 }
 0x15d   :  { %v121_v62 = vpop.xlane.xlu1 %120  ;;  %v123_v63 = vpop.xlane.xlu0 %122 }
 0x15e   :  { %5036 = vrsqrt.f32 %v142_v59  ;;  %v135_v0 = vmul.f32 0.0078125, %v121_v62  ;;  %v136_v1 = vmul.f32 0.0078125, %v123_v63 }
 0x160   :  { %v143_v2 = vadd.f32 1e-05, %v135_v0  ;;  %v144_v3 = vadd.f32 1e-05, %v136_v1 }
 0x161   :  { %v125_v4 = vpop.xlane.xlu1 %124  ;;  %v127_v5 = vpop.xlane.xlu0 %126 }
 0x162   :  { %5038 = vrsqrt.f32 %v143_v2  ;;  %v137_v8 = vmul.f32 0.0078125, %v125_v4  ;;  %v138_v9 = vmul.f32 0.0078125, %v127_v5 }
 0x163   :  { %5040 = vrsqrt.f32 %v144_v3 }
 0x164   :  { %v145_v7 = vadd.f32 1e-05, %v137_v8  ;;  %v146_v10 = vadd.f32 1e-05, %v138_v9 }
 0x165   :  { %v129_v11 = vpop.xlane.xlu1 %128  ;;  %v131_v12 = vpop.xlane.xlu0 %130 }
 0x166   :  { %5042 = vrsqrt.f32 %v145_v7  ;;  %v139_v13 = vmul.f32 0.0078125, %v129_v11  ;;  %v140_v17 = vmul.f32 0.0078125, %v131_v12 }
 0x167   :  { %5044 = vrsqrt.f32 %v146_v10 }
 0x168   :  { %v5037_v14 = vpop.eup %5036  ;;  %v147_v15 = vadd.f32 1e-05, %v139_v13  ;;  %v148_v25 = vadd.f32 1e-05, %v140_v17 }
 0x169   :  { %v133_v19 = vpop.xlane.xlu1 %132  ;;  %v158_v21 = vmul.f32 %v5037_v14, %v5388_v36 }
 0x16a   :  { %5046 = vrsqrt.f32 %v147_v15  ;;  %v141_v27 = vmul.f32 0.0078125, %v133_v19 }
 0x16b   :  { %v173_v23 = vmul.f32 %v5453_v18, %v158_v21  ;;  %5048 = vrsqrt.f32 %v148_v25 }
 0x16c   :  { %v5039_v24 = vpop.eup %5038  ;;  %v149_v34 = vadd.f32 1e-05, %v141_v27 }
 0x16d   :  { %v5041_v29 = vpop.eup %5040  ;;  %v188_v30 = vadd.f32 %v5459_v22, %v173_v23  ;;  %v159_v31 = vmul.f32 %v5039_v24, %v5396_v44 }
 0x16e   :  { %v160_v32 = vmul.f32 %v5041_v29, %v5390_v37  ;;  %5050 = vrsqrt.f32 %v149_v34 }
 0x16f   :  { %309 = vmatmul.mubr.f32.vlgmr.msra.gmra.mrb[0].mxu1 %v188_v30  ;;  %4292 = vmatprep.mubr.f32.mxu0 %v188_v30  ;;  %v174_v36 = vmul.f32 %v5453_v18, %v159_v31 }
 0x170   :  { %v5043_v33 = vpop.eup %5042  ;;  %4836 = vmatpush3.bf16.msra.mxu1 %v5380_v20  ;;  %314 = vmatprep.mubr.f32.mxu1 %v5281_v56  ;;  %v175_v35 = vmul.f32 %v5453_v18, %v160_v32 }
 0x171   :  { %v189_v39 = vadd.f32 %v5459_v22, %v174_v36  ;;  %4829 = vmatprep.subr.bf16.mxu1 %v5383_v28  ;;  %v161_v44 = vmul.f32 %v5043_v33, %v5398_v45  ;;  %v5045_v37 = vpop.eup %5044 }
 0x172   :  { %v190_v40 = vadd.f32 %v5459_v22, %v175_v35  ;;  %v162_v42 = vmul.f32 %v5045_v37, %v5405_v52 }
 0x173   :  { %315 = vmatmul.mubr.f32.gmra.mrb[2].mxu1 %v189_v39  ;;  %4293 = vmatmul.mubr.f32.vlgmr.msra.gmra.mrb[0].mxu0 %v189_v39  ;;  %v176_v41 = vmul.f32 %v5453_v18, %v161_v44 }
 0x174   :  { %4837 = vmatpush3.bf16.msra.mxu1 %v5383_v28  ;;  %4295 = vmatprep.mubr.f32.mxu0 %v190_v40  ;;  %v5047_v45 = vpop.eup %5046  ;;  %v177_v28 = vmul.f32 %v5453_v18, %v162_v42 }
 0x175   :  { %320 = vmatprep.mubr.f32.mxu1 %v5281_v56  ;;  %4830 = vmatprep.subr.bf16.mxu1 %v5424_v6  ;;  %v191_v20 = vadd.f32 %v5459_v22, %v176_v41  ;;  %v163_v43 = vmul.f32 %v5047_v45, %v5408_v53  ;;  %v5049_v46 = vpop.eup %5048 }
 0x176   :  { %v192_v52 = vadd.f32 %v5459_v22, %v177_v28  ;;  %v164_v47 = vmul.f32 %v5049_v46, %v5415_v60 }
 0x177   :  { %321 = vmatmul.mubr.f32.gmra.mrb[4].mxu1 %v190_v40  ;;  %4296 = vmatmul.mubr.f32.gmra.mrb[2].mxu0 %v191_v20 }
 0x178   :  { %4838 = vmatpush3.bf16.msra.mxu1 %v5424_v6  ;;  %326 = vmatprep.mubr.f32.mxu1 %v5281_v56  ;;  %v178_v6 = vmul.f32 %v5453_v18, %v163_v43  ;;  %v5051_v48 = vpop.eup %5050 }
 0x179   :  { %4831 = vmatprep.subr.bf16.mxu1 %v5428_v16  ;;  %v165_v50 = vmul.f32 %v5051_v48, %v5418_v61 }
 0x17a   :  { %v193_v53 = vadd.f32 %v5459_v22, %v178_v6 }
 0x17b   :  { %327 = vmatmul.mubr.f32.gmra.mrb[6].mxu1 %v191_v20 }
 0x17c   :  { %4839 = vmatpush3.bf16.msra.mxu1 %v5428_v16  ;;  %332 = vmatprep.mubr.f32.mxu1 %v5281_v56  ;;  %v179_v16 = vmul.f32 %v5453_v18, %v164_v47 }
 0x17d   :  { %4832 = vmatprep.subr.bf16.mxu1 %v5432_v26 }
 0x17e   :  { %v194_v60 = vadd.f32 %v5459_v22, %v179_v16 }
 0x17f   :  { %333 = vmatmul.mubr.f32.gmra.mrb[8].mxu1 %v192_v52 }
 0x180   :  { %4840 = vmatpush3.bf16.msra.mxu1 %v5432_v26  ;;  %338 = vmatprep.mubr.f32.mxu1 %v5281_v56  ;;  %v180_v26 = vmul.f32 %v5453_v18, %v165_v50 }
 0x181   :  { %4833 = vmatprep.subr.bf16.mxu1 %v5436_v38 }
 0x182   :  { %v195_v51 = vadd.f32 %v5459_v22, %v180_v26 }
 0x183   :  { %339 = vmatmul.mubr.f32.gmra.mrb[10].mxu1 %v193_v53 }
 0x184   :  { %4841 = vmatpush3.bf16.msra.mxu1 %v5436_v38  ;;  %344 = vmatprep.mubr.f32.mxu1 %v5281_v56 }
 0x185   :  { %4834 = vmatprep.subr.bf16.mxu1 %v5440_v49 }
 0x187   :  { %345 = vmatmul.mubr.f32.gmra.mrb[12].mxu1 %v194_v60 }
 0x188   :  { %4842 = vmatpush3.bf16.msra.mxu1 %v5440_v49  ;;  %350 = vmatprep.mubr.f32.mxu1 %v5281_v56 }
 0x189   :  { %4835 = vmatprep.subr.bf16.mxu1 %v5445_v55 }
 0x18b   :  { %351 = vmatmul.mubr.f32.gmra.mrb[14].mxu1 %v195_v51 }
 0x18c   :  { %4843 = vmatpush3.bf16.msra.mxu1 %v5445_v55  ;;  %4298 = vmatprep.mubr.f32.mxu1 %v192_v52 }
 0x18f   :  { %4299 = vmatmul.mubr.f32.vlgmr.msra.gmra.mrb[16].mxu1 %v193_v53 }
 0x190   :  { %4301 = vmatprep.mubr.f32.mxu1 %v194_v60 }
 0x193   :  { %4302 = vmatmul.mubr.f32.gmra.mrb[18].mxu1 %v195_v51 }
 0x242   :  { %v310_v61 = vpop.f32.mrb[0].mxu1 }
 0x243   :  { %470 = vrot.lane.b32.xlu1 %v310_v61, %s5282_s2  ;;  %v312_v38 = vpop.f32.mrb[1].mxu1  ;;  %4308 = vmatprep.mubr.msk.f32.mxu1 %vm655_vm0, %v310_v61 }
 0x246   :  { %v316_v49 = vpop.f32.mrb[2].mxu1  ;;  %v4294_v54 = vpop.f32.mrb[0].mxu0 }
 0x247   :  { %v423_v56 = vpop.f32.mrb[1].mxu0  ;;  %488 = vrot.lane.b32.xlu1 %v316_v49, %s5283_s3  ;;  %v318_v57 = vpop.f32.mrb[3].mxu1 }
 0x248   :  { %v4636_v58 = vpack.c.bf16 %v318_v57, %v312_v38  ;;  %v4856_v59 = vpack.i.bf16 %v318_v57, %v312_v38  ;;  %v5515_v62 = vpack.i.bf16 %v4294_v54, %v423_v56  ;;  %v5517_v63 = vpack.c.bf16 %v4294_v54, %v423_v56 }
 0x24a   :  { %4857 = vrot.lane.b32.xlu0 %v4856_v59, %s5282_s2  ;;  %v5520_v0 = vpop.f32.mrb[4].mxu1  ;;  %v4297_v1 = vpop.f32.mrb[2].mxu0  ;;  %4638 = vmatprep.subr.msk.bf16.mxu1 %vm5511_vm1, %v4636_v58 }
 0x24b   :  { %4862 = vrot.lane.b32.xlu1 %v4856_v59, %s5283_s3  ;;  %v324_v2 = vpop.f32.mrb[5].mxu1  ;;  %v433_v3 = vpop.f32.mrb[3].mxu0  ;;  %4641 = vmatpush3.bf16.xpose.msk.msra.mxu1 %vm5511_vm1, %v4636_v58 }
 0x24c   :  { %v5527_v4 = vpack.i.bf16 %v4297_v1, %v433_v3  ;;  %v5529_v5 = vpack.c.bf16 %v4297_v1, %v433_v3 }
 0x24e   :  { %472 = vrot.lane.b32.xlu0 %v316_v49, %s5282_s2  ;;  %v5532_v8 = vpop.f32.mrb[6].mxu1 }
 0x24f   :  { %4867 = vrot.lane.b32.xlu1 %v4856_v59, %s5284_s19  ;;  %v330_v9 = vpop.f32.mrb[7].mxu1 }
 0x250   :  { %v5535_v7 = vpack.c.bf16 %v330_v9, %v324_v2  ;;  %v4871_v10 = vpack.i.bf16 %v330_v9, %v324_v2 }
 0x252   :  { %486 = vrot.lane.b32.xlu0 %v310_v61, %s5283_s3  ;;  %v5538_v11 = vpop.f32.mrb[8].mxu1  ;;  %4309 = vmatmul.mubr.msk.f32.vlgmr.msra.gmra.mrb[20].mxu1 %vm655_vm0, %v316_v49 }
 0x253   :  { %504 = vrot.lane.b32.xlu1 %v316_v49, %s5284_s19  ;;  %v336_v12 = vpop.f32.mrb[9].mxu1 }
 0x256   :  { %502 = vrot.lane.b32.xlu0 %v310_v61, %s5284_s19  ;;  %v5543_v13 = vpop.f32.mrb[10].mxu1 }
 0x257   :  { %4872 = vrot.lane.b32.xlu1 %v4871_v10, %s5282_s2  ;;  %v342_v14 = vpop.f32.mrb[11].mxu1 }
 0x258   :  { %v5546_v15 = vpack.c.bf16 %v342_v14, %v336_v12  ;;  %v4886_v17 = vpack.i.bf16 %v342_v14, %v336_v12 }
 0x25a   :  { %474 = vrot.lane.b32.xlu0 %v5520_v0, %s5282_s2  ;;  %v5550_v18 = vpop.f32.mrb[12].mxu1 }
 0x25b   :  { %476 = vrot.lane.b32.xlu1 %v5532_v8, %s5282_s2  ;;  %v348_v19 = vpop.f32.mrb[13].mxu1 }
 0x25e   :  { %4877 = vrot.lane.b32.xlu0 %v4871_v10, %s5283_s3  ;;  %v5555_v21 = vpop.f32.mrb[14].mxu1 }
 0x25f   :  { %4882 = vrot.lane.b32.xlu1 %v4871_v10, %s5284_s19  ;;  %v354_v22 = vpop.f32.mrb[15].mxu1 }
 0x260   :  { %v5558_v23 = vpack.c.bf16 %v354_v22, %v348_v19  ;;  %v4901_v24 = vpack.i.bf16 %v354_v22, %v348_v19 }
 0x262   :  { %492 = vrot.lane.b32.xlu0 %v5532_v8, %s5283_s3  ;;  %v4300_v25 = vpop.f32.mrb[16].mxu1 }
 0x263   :  { %490 = vrot.lane.b32.xlu1 %v5520_v0, %s5283_s3  ;;  %v443_v27 = vpop.f32.mrb[17].mxu1 }
 0x264   :  { %v5564_v29 = vpack.i.bf16 %v4300_v25, %v443_v27  ;;  %v5566_v30 = vpack.c.bf16 %v4300_v25, %v443_v27 }
 0x266   :  { %4887 = vrot.lane.b32.xlu0 %v4886_v17, %s5282_s2  ;;  %v4303_v31 = vpop.f32.mrb[18].mxu1 }
 0x267   :  { %506 = vrot.lane.b32.xlu1 %v5520_v0, %s5284_s19  ;;  %v453_v32 = vpop.f32.mrb[19].mxu1 }
 0x268   :  { %v5571_v36 = vpack.i.bf16 %v4303_v31, %v453_v32  ;;  %v5573_v33 = vpack.c.bf16 %v4303_v31, %v453_v32 }
 0x26a   :  { %508 = vrot.lane.b32.xlu0 %v5532_v8, %s5284_s19 }
 0x26b   :  { %478 = vrot.lane.b32.xlu1 %v5538_v11, %s5282_s2 }
 0x26e   :  { %4897 = vrot.lane.b32.xlu0 %v4886_v17, %s5284_s19 }
 0x26f   :  { %4892 = vrot.lane.b32.xlu1 %v4886_v17, %s5283_s3 }
 0x272   :  { %480 = vrot.lane.b32.xlu0 %v5543_v13, %s5282_s2 }
 0x273   :  { %496 = vrot.lane.b32.xlu1 %v5543_v13, %s5283_s3 }
 0x276   :  { %494 = vrot.lane.b32.xlu0 %v5538_v11, %s5283_s3 }
 0x277   :  { %4902 = vrot.lane.b32.xlu1 %v4901_v24, %s5282_s2 }
 0x27a   :  { %510 = vrot.lane.b32.xlu0 %v5538_v11, %s5284_s19 }
 0x27b   :  { %512 = vrot.lane.b32.xlu1 %v5543_v13, %s5284_s19 }
 0x27e   :  { %4907 = vrot.lane.b32.xlu0 %v4901_v24, %s5283_s3 }
 0x27f   :  { %4912 = vrot.lane.b32.xlu1 %v4901_v24, %s5284_s19 }
 0x282   :  { %482 = vrot.lane.b32.xlu0 %v5550_v18, %s5282_s2 }
 0x283   :  { %484 = vrot.lane.b32.xlu1 %v5555_v21, %s5282_s2 }
 0x286   :  { %498 = vrot.lane.b32.xlu0 %v5550_v18, %s5283_s3 }
 0x287   :  { %500 = vrot.lane.b32.xlu1 %v5555_v21, %s5283_s3 }
 0x28a   :  { %514 = vrot.lane.b32.xlu0 %v5550_v18, %s5284_s19 }
 0x28b   :  { %516 = vrot.lane.b32.xlu1 %v5555_v21, %s5284_s19 }
 0x28e   :  { %4917 = vrot.lane.b32.xlu0 %v5515_v62, %s5282_s2 }
 0x28f   :  { %4922 = vrot.lane.b32.xlu1 %v5515_v62, %s5283_s3 }
 0x292   :  { %4932 = vrot.lane.b32.xlu0 %v5527_v4, %s5282_s2 }
 0x293   :  { %4927 = vrot.lane.b32.xlu1 %v5515_v62, %s5284_s19 }
 0x296   :  { %4947 = vrot.lane.b32.xlu0 %v5564_v29, %s5282_s2 }
 0x297   :  { %4937 = vrot.lane.b32.xlu1 %v5527_v4, %s5283_s3 }
 0x29b   :  { %4942 = vrot.lane.b32.xlu1 %v5527_v4, %s5284_s19 }
 0x29f   :  { %4952 = vrot.lane.b32.xlu1 %v5564_v29, %s5283_s3 }
 0x2b5   :  { %v471_v34 = vpop.permute.xlu1 %470 }
 0x2b6   :  { %4315 = vmatprep.mubr.msk.f32.mxu1 %vm655_vm0, %v471_v34 }
 0x2b9   :  { %v489_v35 = vpop.permute.xlu1 %488 }
 0x2bc   :  { %v4858_v39 = vpop.permute.xlu0 %4857 }
 0x2bd   :  { %v4860_v44 = vunpack.i.h.bf16 %v4858_v39  ;;  %v4859_v37 = vunpack.i.l.bf16 %v4858_v39  ;;  %v4863_v40 = vpop.permute.xlu1 %4862 }
 0x2be   :  { %v4865_v41 = vunpack.i.h.bf16 %v4863_v40  ;;  %v4864_v20 = vunpack.i.l.bf16 %v4863_v40 }
 0x2bf   :  { %v4642_v42 = vpack.c.bf16 %v4860_v44, %v4859_v37 }
 0x2c0   :  { %v4648_v45 = vpack.c.bf16 %v4865_v41, %v4864_v20  ;;  %v473_v28 = vpop.permute.xlu0 %472 }
 0x2c1   :  { %v4868_v43 = vpop.permute.xlu1 %4867  ;;  %4644 = vmatprep.subr.msk.bf16.mxu1 %vm5511_vm1, %v4642_v42 }
 0x2c2   :  { %v4870_v46 = vunpack.i.h.bf16 %v4868_v43  ;;  %v4869_v52 = vunpack.i.l.bf16 %v4868_v43  ;;  %4647 = vmatpush3.bf16.xpose.msk.msra.mxu1 %vm5511_vm1, %v4642_v42  ;;  %4650 = vmatprep.subr.msk.bf16.mxu0 %vm5511_vm1, %v4648_v45 }
 0x2c3   :  { %4653 = vmatpush3.bf16.xpose.msk.msra.mxu0 %vm5511_vm1, %v4648_v45 }
 0x2c4   :  { %v4654_v6 = vpack.c.bf16 %v4870_v46, %v4869_v52  ;;  %4662 = vmatprep.subr.msk.bf16.mxu0 %vm5511_vm1, %v5535_v7  ;;  %v487_v47 = vpop.permute.xlu0 %486 }
 0x2c5   :  { %v505_v48 = vpop.permute.xlu1 %504  ;;  %4322 = vmatprep.mubr.msk.f32.mxu0 %vm655_vm0, %v487_v47 }
 0x2c6   :  { %4656 = vmatprep.subr.msk.bf16.mxu1 %vm5511_vm1, %v4654_v6 }
 0x2c8   :  { %v503_v53 = vpop.permute.xlu0 %502 }
 0x2c9   :  { %v4873_v16 = vpop.permute.xlu1 %4872  ;;  %4316 = vmatmul.mubr.msk.f32.vlgmr.msra.gmra.mrb[22].mxu1 %vm655_vm0, %v473_v28 }
 0x2ca   :  { %v4875_v50 = vunpack.i.h.bf16 %v4873_v16  ;;  %v4874_v60 = vunpack.i.l.bf16 %v4873_v16  ;;  %4323 = vmatmul.mubr.msk.f32.vlgmr.msra.gmra.mrb[4].mxu0 %vm655_vm0, %v489_v35  ;;  %4659 = vmatpush3.bf16.xpose.msk.msra.mxu1 %vm5511_vm1, %v4654_v6 }
 0x2cb   :  { %4329 = vmatprep.mubr.msk.f32.mxu1 %vm655_vm0, %v503_v53  ;;  %4665 = vmatpush3.bf16.xpose.msk.msra.mxu0 %vm5511_vm1, %v5535_v7 }
 0x2cc   :  { %v4666_v26 = vpack.c.bf16 %v4875_v50, %v4874_v60  ;;  %4336 = vmatprep.mubr.msk.f32.mxu0 %vm655_vm0, %v5520_v0  ;;  %v475_v51 = vpop.permute.xlu0 %474 }
 0x2cd   :  { %v477_v61 = vpop.permute.xlu1 %476 }
 0x2ce   :  { %4668 = vmatprep.subr.msk.bf16.mxu1 %vm5511_vm1, %v4666_v26 }
 0x2d0   :  { %v4878_v38 = vpop.permute.xlu0 %4877 }
 0x2d1   :  { %v4880_v49 = vunpack.i.h.bf16 %v4878_v38  ;;  %v4879_v54 = vunpack.i.l.bf16 %v4878_v38  ;;  %v4883_v56 = vpop.permute.xlu1 %4882  ;;  %4330 = vmatmul.mubr.msk.f32.vlgmr.msra.gmra.mrb[24].mxu1 %vm655_vm0, %v505_v48 }
 0x2d2   :  { %v4885_v57 = vunpack.i.h.bf16 %v4883_v56  ;;  %v4884_v58 = vunpack.i.l.bf16 %v4883_v56  ;;  %4337 = vmatmul.mubr.msk.f32.vlgmr.msra.gmra.mrb[6].mxu0 %vm655_vm0, %v5532_v8  ;;  %4671 = vmatpush3.bf16.xpose.msk.msra.mxu1 %vm5511_vm1, %v4666_v26 }
 0x2d3   :  { %v4672_v59 = vpack.c.bf16 %v4880_v49, %v4879_v54  ;;  %4343 = vmatprep.mubr.msk.f32.mxu1 %vm655_vm0, %v475_v51 }
 0x2d4   :  { %v4678_v62 = vpack.c.bf16 %v4885_v57, %v4884_v58  ;;  %v493_v0 = vpop.permute.xlu0 %492  ;;  %v5735_v58 = vstv %s6315_s0 }
 0x2d5   :  { %v491_v1 = vpop.permute.xlu1 %490  ;;  %4674 = vmatprep.subr.msk.bf16.mxu0 %vm5511_vm1, %v4672_v59 }
 0x2d6   :  { %4677 = vmatpush3.bf16.xpose.msk.msra.mxu0 %vm5511_vm1, %v4672_v59  ;;  %4350 = vmatprep.mubr.msk.f32.mxu0 %vm655_vm0, %v491_v1 }
 0x2d7   :  { %4680 = vmatprep.subr.msk.bf16.mxu1 %vm5511_vm1, %v4678_v62  ;;  %4686 = vmatprep.subr.msk.bf16.mxu0 %vm5511_vm1, %v5546_v15 }
 0x2d8   :  { %v4888_v2 = vpop.permute.xlu0 %4887 }
 0x2d9   :  { %v4890_v3 = vunpack.i.h.bf16 %v4888_v2  ;;  %v4889_v4 = vunpack.i.l.bf16 %v4888_v2  ;;  %v507_v8 = vpop.permute.xlu1 %506  ;;  %4344 = vmatmul.mubr.msk.f32.vlgmr.msra.gmra.mrb[26].mxu1 %vm655_vm0, %v477_v61 }
 0x2da   :  { %4683 = vmatpush3.bf16.xpose.msk.msra.mxu1 %vm5511_vm1, %v4678_v62  ;;  %4357 = vmatprep.mubr.msk.f32.mxu1 %vm655_vm0, %v507_v8 }
 0x2db   :  { %v4690_v9 = vpack.c.bf16 %v4890_v3, %v4889_v4 }
 0x2dc   :  { %v509_v7 = vpop.permute.xlu0 %508 }
 0x2dd   :  { %v479_v10 = vpop.permute.xlu1 %478  ;;  %4351 = vmatmul.mubr.msk.f32.vlgmr.msra.gmra.mrb[8].mxu0 %vm655_vm0, %v493_v0  ;;  %4692 = vmatprep.subr.msk.bf16.mxu1 %vm5511_vm1, %v4690_v9 }
 0x2de   :  { %4689 = vmatpush3.bf16.xpose.msk.msra.mxu0 %vm5511_vm1, %v5546_v15  ;;  %4364 = vmatprep.mubr.msk.f32.mxu0 %vm655_vm0, %v5538_v11 }
 0x2e0   :  { %v4898_v12 = vpop.permute.xlu0 %4897 }
 0x2e1   :  { %v4900_v14 = vunpack.i.h.bf16 %v4898_v12  ;;  %v4899_v17 = vunpack.i.l.bf16 %v4898_v12  ;;  %v4893_v19 = vpop.permute.xlu1 %4892  ;;  %4358 = vmatmul.mubr.msk.f32.vlgmr.msra.gmra.mrb[28].mxu1 %vm655_vm0, %v509_v7 }
 0x2e2   :  { %v4895_v22 = vunpack.i.h.bf16 %v4893_v19  ;;  %v4894_v24 = vunpack.i.l.bf16 %v4893_v19  ;;  %4695 = vmatpush3.bf16.xpose.msk.msra.mxu1 %vm5511_vm1, %v4690_v9  ;;  %4371 = vmatprep.mubr.msk.f32.mxu1 %vm655_vm0, %v479_v10 }
 0x2e3   :  { %v4702_v25 = vpack.c.bf16 %v4900_v14, %v4899_v17 }
 0x2e4   :  { %v4696_v27 = vpack.c.bf16 %v4895_v22, %v4894_v24  ;;  %v481_v31 = vpop.permute.xlu0 %480 }
 0x2e5   :  { %v497_v15 = vpop.permute.xlu1 %496  ;;  %4365 = vmatmul.mubr.msk.f32.vlgmr.msra.gmra.mrb[10].mxu0 %vm655_vm0, %v5543_v13  ;;  %4704 = vmatprep.subr.msk.bf16.mxu1 %vm5511_vm1, %v4702_v25 }
 0x2e6   :  { %4698 = vmatprep.subr.msk.bf16.mxu0 %vm5511_vm1, %v4696_v27 }
 0x2e7   :  { %4701 = vmatpush3.bf16.xpose.msk.msra.mxu0 %vm5511_vm1, %v4696_v27 }
 0x2e8   :  { %v495_v11 = vpop.permute.xlu0 %494  ;;  %4710 = vmatprep.subr.msk.bf16.mxu0 %vm5511_vm1, %v5558_v23 }
 0x2e9   :  { %v4903_v32 = vpop.permute.xlu1 %4902  ;;  %4372 = vmatmul.mubr.msk.f32.vlgmr.msra.gmra.mrb[30].mxu1 %vm655_vm0, %v481_v31  ;;  %4378 = vmatprep.mubr.msk.f32.mxu0 %vm655_vm0, %v495_v11 }
 0x2ea   :  { %v4905_v13 = vunpack.i.h.bf16 %v4903_v32  ;;  %v4904_v34 = vunpack.i.l.bf16 %v4903_v32  ;;  %4707 = vmatpush3.bf16.xpose.msk.msra.mxu1 %vm5511_vm1, %v4702_v25 }
 0x2ec   :  { %v4714_v35 = vpack.c.bf16 %v4905_v13, %v4904_v34  ;;  %v511_v39 = vpop.permute.xlu0 %510 }
 0x2ed   :  { %v513_v44 = vpop.permute.xlu1 %512  ;;  %4385 = vmatprep.mubr.msk.f32.mxu1 %vm655_vm0, %v511_v39 }
 0x2ee   :  { %4379 = vmatmul.mubr.msk.f32.vlgmr.msra.gmra.mrb[12].mxu0 %vm655_vm0, %v497_v15  ;;  %4716 = vmatprep.subr.msk.bf16.mxu1 %vm5511_vm1, %v4714_v35 }
 0x2ef   :  { %4713 = vmatpush3.bf16.xpose.msk.msra.mxu0 %vm5511_vm1, %v5558_v23  ;;  %4392 = vmatprep.mubr.msk.f32.mxu0 %vm655_vm0, %v5550_v18 }
 0x2f0   :  { %v4908_v37 = vpop.permute.xlu0 %4907 }
 0x2f1   :  { %v4910_v40 = vunpack.i.h.bf16 %v4908_v37  ;;  %v4909_v41 = vunpack.i.l.bf16 %v4908_v37  ;;  %v4913_v20 = vpop.permute.xlu1 %4912  ;;  %4386 = vmatmul.mubr.msk.f32.vlgmr.msra.gmra.mrb[32].mxu1 %vm655_vm0, %v513_v44 }
 0x2f2   :  { %v4915_v42 = vunpack.i.h.bf16 %v4913_v20  ;;  %v4914_v45 = vunpack.i.l.bf16 %v4913_v20  ;;  %4719 = vmatpush3.bf16.xpose.msk.msra.mxu1 %vm5511_vm1, %v4714_v35 }
 0x2f3   :  { %v4720_v28 = vpack.c.bf16 %v4910_v40, %v4909_v41 }
 0x2f4   :  { %v4726_v43 = vpack.c.bf16 %v4915_v42, %v4914_v45  ;;  %v483_v46 = vpop.permute.xlu0 %482 }
 0x2f5   :  { %v485_v52 = vpop.permute.xlu1 %484  ;;  %4399 = vmatprep.mubr.msk.f32.mxu1 %vm655_vm0, %v483_v46  ;;  %4722 = vmatprep.subr.msk.bf16.mxu0 %vm5511_vm1, %v4720_v28 }
 0x2f6   :  { %4393 = vmatmul.mubr.msk.f32.vlgmr.msra.gmra.mrb[14].mxu0 %vm655_vm0, %v5555_v21  ;;  %4728 = vmatprep.subr.msk.bf16.mxu1 %vm5511_vm1, %v4726_v43 }
 0x2f7   :  { %4725 = vmatpush3.bf16.xpose.msk.msra.mxu0 %vm5511_vm1, %v4720_v28 }
 0x2f8   :  { %v499_v18 = vpop.permute.xlu0 %498  ;;  %4733 = vmatprep.subr.bf16.mxu0 %v5517_v63 }
 0x2f9   :  { %v501_v23 = vpop.permute.xlu1 %500  ;;  %4400 = vmatmul.mubr.msk.f32.vlgmr.msra.gmra.mrb[34].mxu1 %vm655_vm0, %v485_v52  ;;  %4406 = vmatprep.mubr.msk.f32.mxu0 %vm655_vm0, %v499_v18 }
 0x2fa   :  { %4731 = vmatpush3.bf16.xpose.msk.msra.mxu1 %vm5511_vm1, %v4726_v43 }
 0x2fc   :  { %v515_v6 = vpop.permute.xlu0 %514 }
 0x2fd   :  { %v517_v47 = vpop.permute.xlu1 %516  ;;  %4413 = vmatprep.mubr.msk.f32.mxu1 %vm655_vm0, %v515_v6 }
 0x2fe   :  { %4407 = vmatmul.mubr.msk.f32.vlgmr.msra.gmra.mrb[16].mxu0 %vm655_vm0, %v501_v23 }
 0x2ff   :  { %4735 = vmatpush3.bf16.msra.mxu0 %v5517_v63  ;;  %v2017_v63 = vlaneseq }
 0x300   :  { %v4918_v21 = vpop.permute.xlu0 %4917 }
 0x301   :  { %v4920_v48 = vunpack.i.h.bf16 %v4918_v21  ;;  %v4919_v53 = vunpack.i.l.bf16 %v4918_v21  ;;  %v4923_v16 = vpop.permute.xlu1 %4922  ;;  %4414 = vmatmul.mubr.msk.f32.vlgmr.msra.gmra.mrb[36].mxu1 %vm655_vm0, %v517_v47  ;;  %v2018_v54 = vshrl.u32 %v2017_v63, 7  ;;  %v2021_v57 = vand.u32 127, %v2017_v63 }
 0x302   :  { %v4925_v50 = vunpack.i.h.bf16 %v4923_v16  ;;  %v4924_v60 = vunpack.i.l.bf16 %v4923_v16 }
 0x303   :  { %v4736_v26 = vpack.c.bf16 %v4920_v48, %v4919_v53  ;;  %v2019_v56 = vadd.s32 8, %v2018_v54  ;;  %vm5742_vm4 = vcmp.eq.s32.totalorder %v2018_v54, %v2021_v57 }
 0x304   :  { %v5726_v51 = vpack.c.bf16 %v4925_v50, %v4924_v60 }
 0x305   :  { %v4928_v55 = vpop.permute.xlu1 %4927  ;;  %4737 = vmatprep.subr.bf16.mxu1 %v4736_v26  ;;  %vm5737_vm2 = vcmp.eq.s32.totalorder %v2019_v56, %v2021_v57  ;;  %v5832_v56 = vpop.permute.xlu0 %4932 }
 0x306   :  { %v4930_v61 = vunpack.i.h.bf16 %v4928_v55  ;;  %v4929_v38 = vunpack.i.l.bf16 %v4928_v55  ;;  %4739 = vmatpush3.bf16.msra.mxu1 %v4736_v26  ;;  %4741 = vmatprep.subr.bf16.mxu0 %v5726_v51 }
 0x308   :  { %v5729_v49 = vpack.c.bf16 %v4930_v61, %v4929_v38 }
 0x309   :  { %v5796_v43 = vpop.permute.xlu1 %4937 }
 0x30a   :  { %4745 = vmatprep.subr.bf16.mxu1 %v5729_v49 }
 0x30d   :  { %v5817_v50 = vpop.permute.xlu1 %4942 }
 0x325   :  { %v4310_v59 = vpop.f32.mrb[20].mxu1 }
 0x326   :  { %v1986_v0 = vmul.f32 %v4310_v59, %v5735_v58  ;;  %v730_v1 = vpop.f32.mrb[21].mxu1 }
 0x327   :  { %v1985_v3 = vmul.f32 %v5735_v58, %v730_v1 }
 0x328   :  { %v5749_v4 = vsel %vm5737_vm2, -1e+30, %v1986_v0 }
 0x329   :  { %v2064_v8 = vsel %vm2060_vm3, %v5749_v4, -inf  ;;  %v5755_v9 = vsel %vm5742_vm4, -1e+30, %v1985_v3 }
 0x32a   :  { %2065 = vmax.xlane.f32.xlu1 %v2064_v8  ;;  %v2061_v7 = vsel %vm2060_vm3, %v5755_v9, -inf  ;;  %v5843_v8 = vpop.permute.xlu1 %4952 }
 0x32b   :  { %2062 = vmax.xlane.f32.xlu0 %v2061_v7 }
 0x39c   :  { %v4317_v10 = vpop.f32.mrb[22].mxu1 }
 0x39d   :  { %v1988_v12 = vmul.f32 %v4317_v10, %v5735_v58  ;;  %v813_v14 = vpop.f32.mrb[23].mxu1  ;;  %v4324_v17 = vpop.f32.mrb[4].mxu0 }
 0x39e   :  { %v1987_v19 = vmul.f32 %v5735_v58, %v813_v14  ;;  %v1990_v22 = vmul.f32 %v4324_v17, %v5735_v58  ;;  %v896_v24 = vpop.f32.mrb[5].mxu0 }
 0x39f   :  { %v5764_v25 = vsel %vm5737_vm2, -1e+30, %v1988_v12  ;;  %v1989_v15 = vmul.f32 %v5735_v58, %v896_v24 }
 0x3a0   :  { %v2070_v27 = vsel %vm2060_vm3, %v5764_v25, -inf  ;;  %v5770_v31 = vsel %vm5737_vm2, -1e+30, %v1990_v22  ;;  %v5777_v32 = vsel %vm5742_vm4, -1e+30, %v1987_v19  ;;  %v5855_v19 = vpop.permute.xlu0 %4947 }
 0x3a1   :  { %2071 = vmax.xlane.f32.xlu0 %v2070_v27  ;;  %v2076_v11 = vsel %vm2060_vm3, %v5770_v31, -inf  ;;  %v2067_v34 = vsel %vm2060_vm3, %v5777_v32, -inf  ;;  %v5784_v37 = vsel %vm5742_vm4, -1e+30, %v1989_v15 }
 0x3a2   :  { %2077 = vmax.xlane.f32.xlu1 %v2076_v11  ;;  %v2073_v45 = vsel %vm2060_vm3, %v5784_v37, -inf }
 0x3a4   :  { %v4331_v13 = vpop.f32.mrb[24].mxu1 }
 0x3a5   :  { %v1992_v35 = vmul.f32 %v4331_v13, %v5735_v58  ;;  %v4338_v39 = vpop.f32.mrb[6].mxu0  ;;  %2068 = vmax.xlane.f32.xlu0 %v2067_v34  ;;  %v979_v44 = vpop.f32.mrb[25].mxu1 }
 0x3a6   :  { %v1994_v40 = vmul.f32 %v4338_v39, %v5735_v58  ;;  %v1991_v41 = vmul.f32 %v5735_v58, %v979_v44  ;;  %v1062_v20 = vpop.f32.mrb[7].mxu0 }
 0x3a7   :  { %v5790_v42 = vsel %vm5737_vm2, -1e+30, %v1992_v35  ;;  %v1993_v46 = vmul.f32 %v5735_v58, %v1062_v20 }
 0x3a8   :  { %v2082_v28 = vsel %vm2060_vm3, %v5790_v42, -inf  ;;  %v5801_v52 = vsel %vm5737_vm2, -1e+30, %v1994_v40  ;;  %v5805_v18 = vsel %vm5742_vm4, -1e+30, %v1991_v41 }
 0x3a9   :  { %2074 = vmax.xlane.f32.xlu0 %v2073_v45  ;;  %2083 = vmax.xlane.f32.xlu1 %v2082_v28  ;;  %v2088_v6 = vsel %vm2060_vm3, %v5801_v52, -inf  ;;  %v2079_v47 = vsel %vm2060_vm3, %v5805_v18, -inf  ;;  %v5814_v53 = vsel %vm5742_vm4, -1e+30, %v1993_v46 }
 0x3aa   :  { %v2085_v55 = vsel %vm2060_vm3, %v5814_v53, -inf }
 0x3ac   :  { %v4345_v23 = vpop.f32.mrb[26].mxu1 }
 0x3ad   :  { %v1996_v21 = vmul.f32 %v4345_v23, %v5735_v58  ;;  %2089 = vmax.xlane.f32.xlu1 %v2088_v6  ;;  %2080 = vmax.xlane.f32.xlu0 %v2079_v47  ;;  %v1145_v48 = vpop.f32.mrb[27].mxu1 }
 0x3ae   :  { %v1995_v16 = vmul.f32 %v5735_v58, %v1145_v48 }
 0x3af   :  { %v5821_v60 = vsel %vm5737_vm2, -1e+30, %v1996_v21 }
 0x3b0   :  { %v4352_v26 = vpop.f32.mrb[8].mxu0  ;;  %v2094_v61 = vsel %vm2060_vm3, %v5821_v60, -inf  ;;  %v5830_v54 = vsel %vm5742_vm4, -1e+30, %v1995_v16 }
 0x3b1   :  { %v1998_v38 = vmul.f32 %v4352_v26, %v5735_v58  ;;  %v1228_v63 = vpop.f32.mrb[9].mxu0  ;;  %2086 = vmax.xlane.f32.xlu0 %v2085_v55  ;;  %2095 = vmax.xlane.f32.xlu1 %v2094_v61  ;;  %v2091_v3 = vsel %vm2060_vm3, %v5830_v54, -inf }
 0x3b2   :  { %v1997_v57 = vmul.f32 %v5735_v58, %v1228_v63 }
 0x3b3   :  { %v5837_v59 = vsel %vm5737_vm2, -1e+30, %v1998_v38 }
 0x3b4   :  { %v4359_v0 = vpop.f32.mrb[28].mxu1  ;;  %v2100_v1 = vsel %vm2060_vm3, %v5837_v59, -inf  ;;  %v5848_v12 = vsel %vm5742_vm4, -1e+30, %v1997_v57 }
 0x3b5   :  { %v2000_v7 = vmul.f32 %v4359_v0, %v5735_v58  ;;  %2101 = vmax.xlane.f32.xlu1 %v2100_v1  ;;  %2092 = vmax.xlane.f32.xlu0 %v2091_v3  ;;  %v1311_v10 = vpop.f32.mrb[29].mxu1  ;;  %v2097_v24 = vsel %vm2060_vm3, %v5848_v12, -inf }
 0x3b6   :  { %v1999_v14 = vmul.f32 %v5735_v58, %v1311_v10 }
 0x3b7   :  { %v5853_v17 = vsel %vm5737_vm2, -1e+30, %v2000_v7  ;;  %v2066_v15 = vpop.xlane.xlu1 %2065 }
 0x3b8   :  { %v4366_v22 = vpop.f32.mrb[10].mxu0  ;;  %v2106_v27 = vsel %vm2060_vm3, %v5853_v17, -inf  ;;  %v5864_v34 = vsel %vm5742_vm4, -1e+30, %v1999_v14  ;;  %v2158_v44 = vsub.f32 %v5749_v4, %v2066_v15  ;;  %v2063_v40 = vpop.xlane.xlu0 %2062 }
 0x3b9   :  { %v2002_v11 = vmul.f32 %v4366_v22, %v5735_v58  ;;  %v1394_v13 = vpop.f32.mrb[11].mxu0  ;;  %2098 = vmax.xlane.f32.xlu0 %v2097_v24  ;;  %2107 = vmax.xlane.f32.xlu1 %v2106_v27  ;;  %v2103_v45 = vsel %vm2060_vm3, %v5864_v34, -inf  ;;  %v2157_v4 = vsub.f32 %v5755_v9, %v2063_v40 }
 0x3ba   :  { %v2001_v35 = vmul.f32 %v5735_v58, %v1394_v13  ;;  %v2191_v21 = vmul.f32 1.442695, %v2158_v44 }
 0x3bb   :  { %v5869_v39 = vsel %vm5737_vm2, -1e+30, %v2002_v11  ;;  %v2189_v38 = vmul.f32 1.442695, %v2157_v4 }
 0x3bc   :  { %v4373_v41 = vpop.f32.mrb[30].mxu1  ;;  %v2112_v20 = vsel %vm2060_vm3, %v5869_v39, -inf  ;;  %v5879_v23 = vsel %vm5742_vm4, -1e+30, %v2001_v35  ;;  %5052 = vpow2.f32 %v2191_v21 }
 0x3bd   :  { %v2004_v28 = vmul.f32 %v4373_v41, %v5735_v58  ;;  %2113 = vmax.xlane.f32.xlu1 %v2112_v20  ;;  %2104 = vmax.xlane.f32.xlu0 %v2103_v45  ;;  %v1477_v46 = vpop.f32.mrb[31].mxu1  ;;  %v2109_v48 = vsel %vm2060_vm3, %v5879_v23, -inf  ;;  %5054 = vpow2.f32 %v2189_v38 }
 0x3be   :  { %v2003_v6 = vmul.f32 %v5735_v58, %v1477_v46 }
 0x3bf   :  { %v5885_v47 = vsel %vm5737_vm2, -1e+30, %v2004_v28 }
 0x3c0   :  { %v2118_v16 = vsel %vm2060_vm3, %v5885_v47, -inf  ;;  %v5893_v55 = vsel %vm5742_vm4, -1e+30, %v2003_v6 }
 0x3c1   :  { %v4380_v26 = vpop.f32.mrb[12].mxu0  ;;  %2110 = vmax.xlane.f32.xlu0 %v2109_v48  ;;  %2119 = vmax.xlane.f32.xlu1 %v2118_v16  ;;  %v2115_v0 = vsel %vm2060_vm3, %v5893_v55, -inf }
 0x3c2   :  { %v2006_v9 = vmul.f32 %v4380_v26, %v5735_v58  ;;  %v1560_v61 = vpop.f32.mrb[13].mxu0 }
 0x3c3   :  { %v2005_v63 = vmul.f32 %v5735_v58, %v1560_v61 }
 0x3c4   :  { %v4387_v57 = vpop.f32.mrb[32].mxu1  ;;  %v5901_v1 = vsel %vm5737_vm2, -1e+30, %v2006_v9 }
 0x3c5   :  { %v2008_v3 = vmul.f32 %v4387_v57, %v5735_v58  ;;  %2116 = vmax.xlane.f32.xlu0 %v2115_v0  ;;  %v1643_v7 = vpop.f32.mrb[33].mxu1  ;;  %v2124_v10 = vsel %vm2060_vm3, %v5901_v1, -inf  ;;  %v5908_v14 = vsel %vm5742_vm4, -1e+30, %v2005_v63 }
 0x3c6   :  { %v2007_v22 = vmul.f32 %v5735_v58, %v1643_v7  ;;  %2125 = vmax.xlane.f32.xlu1 %v2124_v10  ;;  %v2121_v27 = vsel %vm2060_vm3, %v5908_v14, -inf  ;;  %v5937_v4 = vpop.eup %5052 }
 0x3c7   :  { %v5913_v24 = vsel %vm5737_vm2, -1e+30, %v2008_v3  ;;  %v5942_v16 = vpop.eup %5054  ;;  %v2256_v61 = vsel %vm2060_vm3, %v5937_v4, 0.0 }
 0x3c8   :  { %v2130_v15 = vsel %vm2060_vm3, %v5913_v24, -inf  ;;  %v5921_v13 = vsel %vm5742_vm4, -1e+30, %v2007_v22  ;;  %v2253_v3 = vsel %vm2060_vm3, %v5942_v16, 0.0 }
 0x3c9   :  { %v4394_v11 = vpop.f32.mrb[14].mxu0  ;;  %2122 = vmax.xlane.f32.xlu0 %v2121_v27  ;;  %v2127_v20 = vsel %vm2060_vm3, %v5921_v13, -inf }
 0x3ca   :  { %v2010_v35 = vmul.f32 %v4394_v11, %v5735_v58  ;;  %v1726_v44 = vpop.f32.mrb[15].mxu0  ;;  %2131 = vmax.xlane.f32.xlu1 %v2130_v15 }
 0x3cb   :  { %v2009_v40 = vmul.f32 %v5735_v58, %v1726_v44 }
 0x3cc   :  { %v4401_v41 = vpop.f32.mrb[34].mxu1  ;;  %v5929_v45 = vsel %vm5737_vm2, -1e+30, %v2010_v35 }
 0x3cd   :  { %2128 = vmax.xlane.f32.xlu0 %v2127_v20  ;;  %v1809_v28 = vpop.f32.mrb[35].mxu1  ;;  %v2136_v46 = vsel %vm2060_vm3, %v5929_v45, -inf  ;;  %v5935_v6 = vsel %vm5742_vm4, -1e+30, %v2009_v40  ;;  %v2012_v21 = vmul.f32 %v4401_v41, %v5735_v58 }
 0x3ce   :  { %2137 = vmax.xlane.f32.xlu1 %v2136_v46  ;;  %v2133_v48 = vsel %vm2060_vm3, %v5935_v6, -inf  ;;  %v2011_v26 = vmul.f32 %v5735_v58, %v1809_v28 }
 0x3cf   :  { %v5950_v57 = vsel %vm5737_vm2, -1e+30, %v2012_v21 }
 0x3d0   :  { %v2142_v22 = vsel %vm2060_vm3, %v5950_v57, -inf  ;;  %v5959_v27 = vsel %vm5742_vm4, -1e+30, %v2011_v26 }
 0x3d1   :  { %v4408_v9 = vpop.f32.mrb[16].mxu0  ;;  %2134 = vmax.xlane.f32.xlu0 %v2133_v48  ;;  %v2139_v35 = vsel %vm2060_vm3, %v5959_v27, -inf }
 0x3d2   :  { %v2014_v38 = vmul.f32 %v4408_v9, %v5735_v58  ;;  %v1892_v63 = vpop.f32.mrb[17].mxu0  ;;  %2257 = vadd.xlane.f32.xlu1 %v2256_v61 }
 0x3d3   :  { %v2013_v7 = vmul.f32 %v5735_v58, %v1892_v63 }
 0x3d4   :  { %v4415_v0 = vpop.f32.mrb[36].mxu1  ;;  %v5964_v11 = vsel %vm5737_vm2, -1e+30, %v2014_v38 }
 0x3d5   :  { %2254 = vadd.xlane.f32.xlu0 %v2253_v3  ;;  %v1975_v10 = vpop.f32.mrb[37].mxu1  ;;  %v2016_v15 = vmul.f32 %v4415_v0, %v5735_v58  ;;  %v2148_v40 = vsel %vm2060_vm3, %v5964_v11, -inf  ;;  %v5973_v41 = vsel %vm5742_vm4, -1e+30, %v2013_v7 }
 0x3d6   :  { %2143 = vmax.xlane.f32.xlu1 %v2142_v22  ;;  %v2015_v44 = vmul.f32 %v5735_v58, %v1975_v10  ;;  %v2145_v28 = vsel %vm2060_vm3, %v5973_v41, -inf }
 0x3d7   :  { %v5977_v20 = vsel %vm5737_vm2, -1e+30, %v2016_v15 }
 0x3d8   :  { %v2154_v58 = vsel %vm2060_vm3, %v5977_v20, -inf  ;;  %v5985_v46 = vsel %vm5742_vm4, -1e+30, %v2015_v44 }
 0x3d9   :  { %2140 = vmax.xlane.f32.xlu0 %v2139_v35  ;;  %v2151_v21 = vsel %vm2060_vm3, %v5985_v46, -inf }
 0x3da   :  { %2149 = vmax.xlane.f32.xlu1 %v2148_v40 }
 0x3dd   :  { %2146 = vmax.xlane.f32.xlu0 %v2145_v28 }
 0x3de   :  { %2155 = vmax.xlane.f32.xlu1 %v2154_v58 }
 0x3e1   :  { %2152 = vmax.xlane.f32.xlu0 %v2151_v21 }
 0x3ef   :  { %4962 = vrot.lane.b32.xlu1 %v5571_v36, %s5282_s2 }
 0x3f7   :  { %4957 = vrot.lane.b32.xlu0 %v5564_v29, %s5284_s19 }
 0x42e   :  { %v2072_v62 = vpop.xlane.xlu0 %2071 }
 0x42f   :  { %v2160_v48 = vsub.f32 %v5764_v25, %v2072_v62  ;;  %v2078_v26 = vpop.xlane.xlu1 %2077 }
 0x430   :  { %v2162_v9 = vsub.f32 %v5770_v31, %v2078_v26 }
 0x431   :  { %v2195_v2 = vmul.f32 1.442695, %v2160_v48 }
 0x432   :  { %v2199_v61 = vmul.f32 1.442695, %v2162_v9  ;;  %v2069_v38 = vpop.xlane.xlu0 %2068 }
 0x433   :  { %5056 = vpow2.f32 %v2195_v2  ;;  %v2159_v63 = vsub.f32 %v5777_v32, %v2069_v38 }
 0x434   :  { %5058 = vpow2.f32 %v2199_v61 }
 0x435   :  { %v2193_v0 = vmul.f32 1.442695, %v2159_v63 }
 0x436   :  { %v2075_v3 = vpop.xlane.xlu0 %2074  ;;  %v2084_v7 = vpop.xlane.xlu1 %2083 }
 0x437   :  { %5060 = vpow2.f32 %v2193_v0  ;;  %v2161_v10 = vsub.f32 %v5784_v37, %v2075_v3  ;;  %v2164_v29 = vsub.f32 %v5790_v42, %v2084_v7 }
 0x439   :  { %v2197_v22 = vmul.f32 1.442695, %v2161_v10  ;;  %v2203_v25 = vmul.f32 1.442695, %v2164_v29 }
 0x43a   :  { %v2090_v15 = vpop.xlane.xlu1 %2089  ;;  %v2081_v35 = vpop.xlane.xlu0 %2080 }
 0x43b   :  { %5062 = vpow2.f32 %v2197_v22  ;;  %v2166_v31 = vsub.f32 %v5801_v52, %v2090_v15  ;;  %v2163_v44 = vsub.f32 %v5805_v18, %v2081_v35 }
 0x43c   :  { %5064 = vpow2.f32 %v2203_v25 }
 0x43d   :  { %v6000_v32 = vpop.eup %5056  ;;  %v2207_v40 = vmul.f32 1.442695, %v2166_v31  ;;  %v2201_v28 = vmul.f32 1.442695, %v2163_v44 }
 0x43e   :  { %v2087_v58 = vpop.xlane.xlu0 %2086  ;;  %v2096_v21 = vpop.xlane.xlu1 %2095  ;;  %v2262_v37 = vsel %vm2060_vm3, %v6000_v32, 0.0 }
 0x43f   :  { %v6004_v42 = vpop.eup %5058  ;;  %5066 = vpow2.f32 %v2207_v40  ;;  %v2165_v62 = vsub.f32 %v5814_v53, %v2087_v58  ;;  %v2168_v48 = vsub.f32 %v5821_v60, %v2096_v21  ;;  %2263 = vadd.xlane.f32.xlu1 %v2262_v37 }
 0x440   :  { %5068 = vpow2.f32 %v2201_v28  ;;  %v2268_v61 = vsel %vm2060_vm3, %v6004_v42, 0.0 }
 0x441   :  { %v6008_v52 = vpop.eup %5060  ;;  %v2205_v18 = vmul.f32 1.442695, %v2165_v62  ;;  %v2211_v26 = vmul.f32 1.442695, %v2168_v48 }
 0x442   :  { %v2102_v9 = vpop.xlane.xlu1 %2101  ;;  %v2093_v2 = vpop.xlane.xlu0 %2092  ;;  %v2259_v38 = vsel %vm2060_vm3, %v6008_v52, 0.0 }
 0x443   :  { %5070 = vpow2.f32 %v2205_v18  ;;  %v2170_v63 = vsub.f32 %v5837_v59, %v2102_v9  ;;  %v2167_v53 = vsub.f32 %v5830_v54, %v2093_v2  ;;  %2269 = vadd.xlane.f32.xlu1 %v2268_v61  ;;  %2260 = vadd.xlane.f32.xlu0 %v2259_v38 }
 0x444   :  { %5072 = vpow2.f32 %v2211_v26 }
 0x445   :  { %v6016_v60 = vpop.eup %5062  ;;  %v2215_v0 = vmul.f32 1.442695, %v2170_v63  ;;  %v2209_v3 = vmul.f32 1.442695, %v2167_v53 }
 0x446   :  { %v6018_v7 = vpop.eup %5064  ;;  %v2099_v10 = vpop.xlane.xlu0 %2098  ;;  %v2265_v22 = vsel %vm2060_vm3, %v6016_v60, 0.0 }
 0x447   :  { %v2108_v29 = vpop.xlane.xlu1 %2107  ;;  %5074 = vpow2.f32 %v2215_v0  ;;  %v2169_v25 = vsub.f32 %v5848_v12, %v2099_v10  ;;  %v2274_v54 = vsel %vm2060_vm3, %v6018_v7, 0.0  ;;  %2266 = vadd.xlane.f32.xlu0 %v2265_v22 }
 0x448   :  { %v2172_v59 = vsub.f32 %v5853_v17, %v2108_v29  ;;  %5076 = vpow2.f32 %v2209_v3  ;;  %2275 = vadd.xlane.f32.xlu1 %v2274_v54 }
 0x449   :  { %v6026_v15 = vpop.eup %5066  ;;  %v2213_v35 = vmul.f32 1.442695, %v2169_v25 }
 0x44a   :  { %v2219_v31 = vmul.f32 1.442695, %v2172_v59  ;;  %v6028_v44 = vpop.eup %5068  ;;  %v2105_v28 = vpop.xlane.xlu0 %2104  ;;  %v2280_v58 = vsel %vm2060_vm3, %v6026_v15, 0.0 }
 0x44b   :  { %v2114_v40 = vpop.xlane.xlu1 %2113  ;;  %5078 = vpow2.f32 %v2213_v35  ;;  %v2171_v17 = vsub.f32 %v5864_v34, %v2105_v28  ;;  %v2271_v21 = vsel %vm2060_vm3, %v6028_v44, 0.0 }
 0x44c   :  { %v2174_v12 = vsub.f32 %v5869_v39, %v2114_v40  ;;  %5080 = vpow2.f32 %v2219_v31  ;;  %2281 = vadd.xlane.f32.xlu1 %v2280_v58  ;;  %2272 = vadd.xlane.f32.xlu0 %v2271_v21 }
 0x44d   :  { %v6036_v37 = vpop.eup %5070  ;;  %v2217_v48 = vmul.f32 1.442695, %v2171_v17 }
 0x44e   :  { %v2223_v62 = vmul.f32 1.442695, %v2174_v12  ;;  %v6038_v18 = vpop.eup %5072  ;;  %v2111_v26 = vpop.xlane.xlu0 %2110  ;;  %v2277_v2 = vsel %vm2060_vm3, %v6036_v37, 0.0 }
 0x44f   :  { %v2120_v9 = vpop.xlane.xlu1 %2119  ;;  %v2173_v34 = vsub.f32 %v5879_v23, %v2111_v26  ;;  %v2286_v61 = vsel %vm2060_vm3, %v6038_v18, 0.0 }
 0x450   :  { %5082 = vpow2.f32 %v2223_v62  ;;  %v2176_v39 = vsub.f32 %v5885_v47, %v2120_v9  ;;  %2287 = vadd.xlane.f32.xlu1 %v2286_v61  ;;  %2278 = vadd.xlane.f32.xlu0 %v2277_v2 }
 0x451   :  { %5084 = vpow2.f32 %v2217_v48  ;;  %v6046_v38 = vpop.eup %5074  ;;  %v2221_v63 = vmul.f32 1.442695, %v2173_v34 }
 0x452   :  { %v2227_v53 = vmul.f32 1.442695, %v2176_v39  ;;  %v6048_v0 = vpop.eup %5076  ;;  %v2117_v3 = vpop.xlane.xlu0 %2116  ;;  %v2292_v10 = vsel %vm2060_vm3, %v6046_v38, 0.0 }
 0x453   :  { %5086 = vpow2.f32 %v2221_v63  ;;  %v2175_v23 = vsub.f32 %v5893_v55, %v2117_v3  ;;  %v2126_v47 = vpop.xlane.xlu1 %2125  ;;  %v2283_v29 = vsel %vm2060_vm3, %v6048_v0, 0.0 }
 0x454   :  { %5088 = vpow2.f32 %v2227_v53  ;;  %v2178_v22 = vsub.f32 %v5901_v1, %v2126_v47  ;;  %2293 = vadd.xlane.f32.xlu1 %v2292_v10  ;;  %2284 = vadd.xlane.f32.xlu0 %v2283_v29 }
 0x455   :  { %v6056_v25 = vpop.eup %5078  ;;  %v2225_v59 = vmul.f32 1.442695, %v2175_v23 }
 0x456   :  { %v6058_v54 = vpop.eup %5080  ;;  %v2231_v35 = vmul.f32 1.442695, %v2178_v22  ;;  %v2123_v31 = vpop.xlane.xlu0 %2122  ;;  %v2289_v40 = vsel %vm2060_vm3, %v6056_v25, 0.0 }
 0x457   :  { %5090 = vpow2.f32 %v2225_v59  ;;  %v2177_v55 = vsub.f32 %v5908_v14, %v2123_v31  ;;  %v2132_v28 = vpop.xlane.xlu1 %2131  ;;  %v2298_v58 = vsel %vm2060_vm3, %v6058_v54, 0.0 }
 0x458   :  { %5092 = vpow2.f32 %v2231_v35  ;;  %v2180_v1 = vsub.f32 %v5913_v24, %v2132_v28  ;;  %2299 = vadd.xlane.f32.xlu1 %v2298_v58  ;;  %2290 = vadd.xlane.f32.xlu0 %v2289_v40 }
 0x459   :  { %v2229_v17 = vmul.f32 1.442695, %v2177_v55 }
 0x45a   :  { %v6066_v12 = vpop.eup %5082  ;;  %v2235_v62 = vmul.f32 1.442695, %v2180_v1  ;;  %v2129_v48 = vpop.xlane.xlu0 %2128 }
 0x45b   :  { %v6068_v21 = vpop.eup %5084  ;;  %v2304_v26 = vsel %vm2060_vm3, %v6066_v12, 0.0  ;;  %5094 = vpow2.f32 %v2229_v17  ;;  %v2179_v14 = vsub.f32 %v5921_v13, %v2129_v48  ;;  %v2138_v9 = vpop.xlane.xlu1 %2137 }
 0x45c   :  { %v2295_v2 = vsel %vm2060_vm3, %v6068_v21, 0.0  ;;  %5096 = vpow2.f32 %v2235_v62  ;;  %v2182_v24 = vsub.f32 %v5929_v45, %v2138_v9  ;;  %2305 = vadd.xlane.f32.xlu1 %v2304_v26 }
 0x45d   :  { %2296 = vadd.xlane.f32.xlu0 %v2295_v2  ;;  %v6076_v34 = vpop.eup %5086  ;;  %v2233_v39 = vmul.f32 1.442695, %v2179_v14 }
 0x45e   :  { %v6078_v61 = vpop.eup %5088  ;;  %v2239_v63 = vmul.f32 1.442695, %v2182_v24  ;;  %v2135_v53 = vpop.xlane.xlu0 %2134  ;;  %v2301_v3 = vsel %vm2060_vm3, %v6076_v34, 0.0 }
 0x45f   :  { %5098 = vpow2.f32 %v2233_v39  ;;  %v2181_v13 = vsub.f32 %v5935_v6, %v2135_v53  ;;  %v2258_v10 = vpop.xlane.xlu1 %2257  ;;  %v2310_v23 = vsel %vm2060_vm3, %v6078_v61, 0.0 }
 0x460   :  { %5100 = vpow2.f32 %v2239_v63  ;;  %2311 = vadd.xlane.f32.xlu1 %v2310_v23 }
 0x461   :  { %2302 = vadd.xlane.f32.xlu0 %v2301_v3  ;;  %v6085_v45 = vpop.eup %5090  ;;  %v2237_v47 = vmul.f32 1.442695, %v2181_v13  ;;  %5102 = vrcp.f32 %v2258_v10 }
 0x462   :  { %v6087_v29 = vpop.eup %5092  ;;  %v2255_v22 = vpop.xlane.xlu0 %2254  ;;  %v2307_v59 = vsel %vm2060_vm3, %v6085_v45, 0.0 }
 0x463   :  { %5104 = vpow2.f32 %v2237_v47  ;;  %v2144_v35 = vpop.xlane.xlu1 %2143  ;;  %v2316_v6 = vsel %vm2060_vm3, %v6087_v29, 0.0 }
 0x464   :  { %5106 = vrcp.f32 %v2255_v22  ;;  %v2184_v31 = vsub.f32 %v5950_v57, %v2144_v35  ;;  %2317 = vadd.xlane.f32.xlu1 %v2316_v6 }
 0x465   :  { %2308 = vadd.xlane.f32.xlu0 %v2307_v59  ;;  %v6094_v40 = vpop.eup %5094 }
 0x466   :  { %v6096_v55 = vpop.eup %5096  ;;  %v2243_v28 = vmul.f32 1.442695, %v2184_v31  ;;  %v2141_v58 = vpop.xlane.xlu0 %2140  ;;  %v2313_v1 = vsel %vm2060_vm3, %v6094_v40, 0.0 }
 0x467   :  { %v2183_v17 = vsub.f32 %v5959_v27, %v2141_v58  ;;  %v2150_v62 = vpop.xlane.xlu1 %2149  ;;  %v2322_v48 = vsel %vm2060_vm3, %v6096_v55, 0.0 }
 0x468   :  { %5108 = vpow2.f32 %v2243_v28  ;;  %v2186_v57 = vsub.f32 %v5964_v11, %v2150_v62  ;;  %2323 = vadd.xlane.f32.xlu1 %v2322_v48 }
 0x469   :  { %2314 = vadd.xlane.f32.xlu0 %v2313_v1  ;;  %v6104_v26 = vpop.eup %5098  ;;  %v2241_v14 = vmul.f32 1.442695, %v2183_v17 }
 0x46a   :  { %v6106_v9 = vpop.eup %5100  ;;  %v2247_v2 = vmul.f32 1.442695, %v2186_v57  ;;  %v2147_v24 = vpop.xlane.xlu0 %2146  ;;  %v2319_v39 = vsel %vm2060_vm3, %v6104_v26, 0.0 }
 0x46b   :  { %5110 = vpow2.f32 %v2241_v14  ;;  %v2185_v27 = vsub.f32 %v5973_v41, %v2147_v24  ;;  %v2156_v63 = vpop.xlane.xlu1 %2155  ;;  %v2328_v53 = vsel %vm2060_vm3, %v6106_v9, 0.0  ;;  %v5103_v11 = vpop.eup %5102 }
 0x46c   :  { %5112 = vpow2.f32 %v2247_v2  ;;  %v2188_v3 = vsub.f32 %v5977_v20, %v2156_v63  ;;  %2329 = vadd.xlane.f32.xlu1 %v2328_v53  ;;  %v2382_v6 = vmul.f32 %v5103_v11, %v5937_v4 }
 0x46d   :  { %2320 = vadd.xlane.f32.xlu0 %v2319_v39  ;;  %v6114_v13 = vpop.eup %5104  ;;  %v2245_v10 = vmul.f32 1.442695, %v2185_v27 }
 0x46e   :  { %v5107_v23 = vpop.eup %5106  ;;  %v2251_v47 = vmul.f32 1.442695, %v2188_v3  ;;  %v2153_v22 = vpop.xlane.xlu0 %2152  ;;  %v2325_v59 = vsel %vm2060_vm3, %v6114_v13, 0.0 }
 0x46f   :  { %5114 = vpow2.f32 %v2245_v10  ;;  %v2187_v41 = vsub.f32 %v5985_v46, %v2153_v22  ;;  %v2381_v35 = vmul.f32 %v5107_v23, %v5942_v16  ;;  %v6153_v14 = vpop.permute.xlu1 %4962 }
 0x470   :  { %5116 = vpow2.f32 %v2251_v47  ;;  %2326 = vadd.xlane.f32.xlu1 %v2325_v59  ;;  %v4934_v47 = vunpack.i.l.bf16 %v5832_v56 }
 0x471   :  { %v2249_v20 = vmul.f32 1.442695, %v2187_v41  ;;  %4420 = vmatprep.mubr.msk.f32.mxu0 %vm2060_vm3, %v2381_v35 }
 0x472   :  { %v6122_v31 = vpop.eup %5108  ;;  %4421 = vmatmul.mubr.msk.f32.vlgmr.msra.gmra.mrb[18].mxu0 %vm2060_vm3, %v2382_v6  ;;  %v6155_v2 = vpop.permute.xlu0 %4957 }
 0x473   :  { %5118 = vpow2.f32 %v2249_v20  ;;  %4743 = vmatpush3.bf16.msra.mxu0 %v5726_v51  ;;  %v2334_v28 = vsel %vm2060_vm3, %v6122_v31, 0.0 }
 0x474   :  { %4749 = vmatprep.subr.bf16.mxu0 %v5529_v5  ;;  %2335 = vadd.xlane.f32.xlu0 %v2334_v28  ;;  %v4940_v28 = vunpack.i.h.bf16 %v5796_v43 }
 0x475   :  { %v6129_v16 = vpop.eup %5110 }
 0x476   :  { %v6131_v4 = vpop.eup %5112  ;;  %v2331_v46 = vsel %vm2060_vm3, %v6129_v16, 0.0 }
 0x477   :  { %2332 = vadd.xlane.f32.xlu1 %v2331_v46  ;;  %v2340_v58 = vsel %vm2060_vm3, %v6131_v4, 0.0  ;;  %v4939_v46 = vunpack.i.l.bf16 %v5796_v43 }
 0x478   :  { %2341 = vadd.xlane.f32.xlu0 %v2340_v58 }
 0x479   :  { %v6137_v1 = vpop.eup %5114 }
 0x47a   :  { %v6139_v51 = vpop.eup %5116  ;;  %v2337_v17 = vsel %vm2060_vm3, %v6137_v1, 0.0 }
 0x47b   :  { %2338 = vadd.xlane.f32.xlu1 %v2337_v17  ;;  %v2346_v62 = vsel %vm2060_vm3, %v6139_v51, 0.0 }
 0x47c   :  { %2347 = vadd.xlane.f32.xlu0 %v2346_v62  ;;  %v4756_v62 = vpack.c.bf16 %v4940_v28, %v4939_v46 }
 0x47d   :  { %v6145_v48 = vpop.eup %5118 }
 0x47e   :  { %v2343_v57 = vsel %vm2060_vm3, %v6145_v48, 0.0 }
 0x480   :  { %2344 = vadd.xlane.f32.xlu0 %v2343_v57 }
 0x48c   :  { %4972 = vrot.lane.b32.xlu1 %v5571_v36, %s5284_s19 }
 0x496   :  { %4967 = vrot.lane.b32.xlu0 %v5571_v36, %s5283_s3  ;;  %v4935_v36 = vunpack.i.h.bf16 %v5832_v56 }
 0x498   :  { %v4752_v58 = vpack.c.bf16 %v4935_v36, %v4934_v47  ;;  %v4949_v36 = vunpack.i.l.bf16 %v5855_v19 }
 0x4cc   :  { %v2264_v24 = vpop.xlane.xlu1 %2263 }
 0x4cd   :  { %5120 = vrcp.f32 %v2264_v24 }
 0x4d0   :  { %v2270_v39 = vpop.xlane.xlu1 %2269  ;;  %v2261_v27 = vpop.xlane.xlu0 %2260 }
 0x4d1   :  { %5122 = vrcp.f32 %v2261_v27 }
 0x4d2   :  { %5124 = vrcp.f32 %v2270_v39 }
 0x4d4   :  { %v2267_v63 = vpop.xlane.xlu0 %2266 }
 0x4d5   :  { %v2276_v53 = vpop.xlane.xlu1 %2275  ;;  %5126 = vrcp.f32 %v2267_v63 }
 0x4d6   :  { %5128 = vrcp.f32 %v2276_v53 }
 0x4d7   :  { %v5121_v10 = vpop.eup %5120 }
 0x4d8   :  { %v2384_v6 = vmul.f32 %v5121_v10, %v6000_v32 }
 0x4d9   :  { %v2282_v11 = vpop.xlane.xlu1 %2281  ;;  %v2273_v3 = vpop.xlane.xlu0 %2272 }
 0x4da   :  { %5130 = vrcp.f32 %v2273_v3 }
 0x4db   :  { %v5123_v23 = vpop.eup %5122  ;;  %5132 = vrcp.f32 %v2282_v11 }
 0x4dc   :  { %v2383_v41 = vmul.f32 %v5123_v23, %v6008_v52  ;;  %v5125_v35 = vpop.eup %5124  ;;  %v4950_v23 = vunpack.i.h.bf16 %v5855_v19  ;;  %v4955_v19 = vunpack.i.h.bf16 %v5843_v8 }
 0x4dd   :  { %v2288_v22 = vpop.xlane.xlu1 %2287  ;;  %v2279_v59 = vpop.xlane.xlu0 %2278  ;;  %v2386_v17 = vmul.f32 %v5125_v35, %v6004_v42  ;;  %v4944_v42 = vunpack.i.l.bf16 %v5817_v50 }
 0x4de   :  { %5134 = vrcp.f32 %v2279_v59  ;;  %4427 = vmatprep.mubr.msk.f32.mxu1 %vm2060_vm3, %v2383_v41  ;;  %v4768_v35 = vpack.c.bf16 %v4950_v23, %v4949_v36 }
 0x4df   :  { %v5127_v20 = vpop.eup %5126  ;;  %4428 = vmatmul.mubr.msk.f32.vlgmr.msra.gmra.mrb[38].mxu1 %vm2060_vm3, %v2384_v6  ;;  %5136 = vrcp.f32 %v2288_v22  ;;  %v4954_v6 = vunpack.i.l.bf16 %v5843_v8  ;;  %v4959_v8 = vunpack.i.l.bf16 %v6155_v2 }
 0x4e0   :  { %v2385_v56 = vmul.f32 %v5127_v20, %v6016_v60  ;;  %4747 = vmatpush3.bf16.msra.mxu1 %v5729_v49  ;;  %v5129_v43 = vpop.eup %5128  ;;  %v4945_v60 = vunpack.i.h.bf16 %v5817_v50 }
 0x4e1   :  { %v2294_v52 = vpop.xlane.xlu1 %2293  ;;  %v2285_v32 = vpop.xlane.xlu0 %2284  ;;  %4753 = vmatprep.subr.bf16.mxu1 %v4752_v58  ;;  %v2388_v27 = vmul.f32 %v5129_v43, %v6018_v7 }
 0x4e2   :  { %4434 = vmatprep.mubr.msk.f32.mxu0 %vm2060_vm3, %v2385_v56  ;;  %5138 = vrcp.f32 %v2285_v32  ;;  %v4760_v11 = vpack.c.bf16 %v4945_v60, %v4944_v42  ;;  %v4772_v56 = vpack.c.bf16 %v4955_v19, %v4954_v6 }
 0x4e3   :  { %4435 = vmatmul.mubr.msk.f32.vlgmr.msra.gmra.mrb[20].mxu0 %vm2060_vm3, %v2386_v17  ;;  %5140 = vrcp.f32 %v2294_v52  ;;  %v4960_v17 = vunpack.i.h.bf16 %v6155_v2 }
 0x4e4   :  { %4751 = vmatpush3.bf16.msra.mxu0 %v5529_v5  ;;  %v5131_v57 = vpop.eup %5130 }
 0x4e5   :  { %v2300_v24 = vpop.xlane.xlu1 %2299  ;;  %4757 = vmatprep.subr.bf16.mxu0 %v4756_v62  ;;  %v2291_v49 = vpop.xlane.xlu0 %2290  ;;  %v2387_v39 = vmul.f32 %v5131_v57, %v6028_v44  ;;  %v4776_v57 = vpack.c.bf16 %v4960_v17, %v4959_v8  ;;  %v3831_v17 = vld [vmem:[#allocation8] sm:$0xff]  ;;  %v3832_v8 = vld [vmem:[#allocation8 + $0x8] sm:$0xff] }
 0x4e6   :  { %5142 = vrcp.f32 %v2291_v49  ;;  %v5133_v63 = vpop.eup %5132  ;;  %v4964_v49 = vunpack.i.l.bf16 %v6153_v14 }
 0x4e7   :  { %4441 = vmatprep.mubr.msk.f32.mxu1 %vm2060_vm3, %v2387_v39  ;;  %5144 = vrcp.f32 %v2300_v24  ;;  %v2390_v10 = vmul.f32 %v5133_v63, %v6026_v15  ;;  %v4965_v24 = vunpack.i.h.bf16 %v6153_v14 }
 0x4e8   :  { %v5135_v53 = vpop.eup %5134  ;;  %4442 = vmatmul.mubr.msk.f32.vlgmr.msra.gmra.mrb[40].mxu1 %vm2060_vm3, %v2388_v27 }
 0x4e9   :  { %v2306_v5 = vpop.xlane.xlu1 %2305  ;;  %4755 = vmatpush3.bf16.msra.mxu1 %v4752_v58  ;;  %v2389_v50 = vmul.f32 %v5135_v53, %v6036_v37  ;;  %v5137_v44 = vpop.eup %5136  ;;  %v4784_v53 = vpack.c.bf16 %v4965_v24, %v4964_v49  ;;  %v3843_v24 = vld [vmem:[#allocation8 + $0x60] sm:$0xff]  ;;  %v3844_v49 = vld [vmem:[#allocation8 + $0x68] sm:$0xff] }
 0x4ea   :  { %v2297_v3 = vpop.xlane.xlu0 %2296  ;;  %4761 = vmatprep.subr.bf16.mxu1 %v4760_v11  ;;  %v2392_v15 = vmul.f32 %v5137_v44, %v6038_v18 }
 0x4eb   :  { %5146 = vrcp.f32 %v2297_v3  ;;  %4448 = vmatprep.mubr.msk.f32.mxu0 %vm2060_vm3, %v2389_v50 }
 0x4ec   :  { %v5139_v7 = vpop.eup %5138  ;;  %4449 = vmatmul.mubr.msk.f32.vlgmr.msra.gmra.mrb[22].mxu0 %vm2060_vm3, %v2390_v10  ;;  %5148 = vrcp.f32 %v2306_v5 }
 0x4ed   :  { %v2312_v47 = vpop.xlane.xlu1 %2311  ;;  %4759 = vmatpush3.bf16.msra.mxu0 %v4756_v62  ;;  %v2391_v37 = vmul.f32 %v5139_v7, %v6048_v0  ;;  %v5141_v59 = vpop.eup %5140 }
 0x4ee   :  { %v2303_v22 = vpop.xlane.xlu0 %2302  ;;  %4765 = vmatprep.subr.bf16.mxu0 %v5566_v30  ;;  %v2394_v0 = vmul.f32 %v5141_v59, %v6046_v38 }
 0x4ef   :  { %5150 = vrcp.f32 %v2303_v22  ;;  %4455 = vmatprep.mubr.msk.f32.mxu1 %vm2060_vm3, %v2391_v37 }
 0x4f0   :  { %v5143_v41 = vpop.eup %5142  ;;  %5152 = vrcp.f32 %v2312_v47  ;;  %4456 = vmatmul.mubr.msk.f32.vlgmr.msra.gmra.mrb[42].mxu1 %vm2060_vm3, %v2392_v15 }
 0x4f1   :  { %v2318_v28 = vpop.xlane.xlu1 %2317  ;;  %4763 = vmatpush3.bf16.msra.mxu1 %v4760_v11  ;;  %v2393_v18 = vmul.f32 %v5143_v41, %v6056_v25  ;;  %v5145_v46 = vpop.eup %5144 }
 0x4f2   :  { %v2309_v20 = vpop.xlane.xlu0 %2308  ;;  %4769 = vmatprep.subr.bf16.mxu1 %v4768_v35  ;;  %v2396_v25 = vmul.f32 %v5145_v46, %v6058_v54 }
 0x4f3   :  { %5154 = vrcp.f32 %v2309_v20  ;;  %4462 = vmatprep.mubr.msk.f32.mxu0 %vm2060_vm3, %v2393_v18 }
 0x4f4   :  { %5156 = vrcp.f32 %v2318_v28  ;;  %4463 = vmatmul.mubr.msk.f32.vlgmr.msra.gmra.mrb[24].mxu0 %vm2060_vm3, %v2394_v0 }
 0x4f5   :  { %v5147_v58 = vpop.eup %5146  ;;  %v2324_v32 = vpop.xlane.xlu1 %2323  ;;  %4767 = vmatpush3.bf16.msra.mxu0 %v5566_v30 }
 0x4f6   :  { %v2315_v52 = vpop.xlane.xlu0 %2314  ;;  %v2395_v38 = vmul.f32 %v5147_v58, %v6068_v21  ;;  %4773 = vmatprep.subr.bf16.mxu0 %v4772_v56  ;;  %v5149_v62 = vpop.eup %5148 }
 0x4f7   :  { %5158 = vrcp.f32 %v2315_v52  ;;  %v2398_v21 = vmul.f32 %v5149_v62, %v6066_v12  ;;  %v3833_v52 = vld [vmem:[#allocation8 + $0x10] sm:$0xff] }
 0x4f8   :  { %4469 = vmatprep.mubr.msk.f32.mxu1 %vm2060_vm3, %v2395_v38  ;;  %5160 = vrcp.f32 %v2324_v32  ;;  %v4796_v32 = vpack.c.bf16 %v3832_v8, %v3831_v17  ;;  %v3834_v38 = vld [vmem:[#allocation8 + $0x18] sm:$0xff]  ;;  %v3837_v62 = vld [vmem:[#allocation8 + $0x30] sm:$0xff] }
 0x4f9   :  { %v5151_v43 = vpop.eup %5150  ;;  %4470 = vmatmul.mubr.msk.f32.vlgmr.msra.gmra.mrb[44].mxu1 %vm2060_vm3, %v2396_v25  ;;  %v2330_v60 = vpop.xlane.xlu1 %2329  ;;  %v3835_v25 = vld [vmem:[#allocation8 + $0x20] sm:$0xff] }
 0x4fa   :  { %v2321_v2 = vpop.xlane.xlu0 %2320  ;;  %4771 = vmatpush3.bf16.msra.mxu1 %v4768_v35  ;;  %v2397_v30 = vmul.f32 %v5151_v43, %v6076_v34  ;;  %v5153_v42 = vpop.eup %5152  ;;  %v3838_v43 = vld [vmem:[#allocation8 + $0x38] sm:$0xff] }
 0x4fb   :  { %5162 = vrcp.f32 %v2321_v2  ;;  %4777 = vmatprep.subr.bf16.mxu1 %v4776_v57  ;;  %v2400_v63 = vmul.f32 %v5153_v42, %v6078_v61  ;;  %v3839_v2 = vld [vmem:[#allocation8 + $0x40] sm:$0xff]  ;;  %v3841_v42 = vld [vmem:[#allocation8 + $0x50] sm:$0xff] }
 0x4fc   :  { %4476 = vmatprep.mubr.msk.f32.mxu0 %vm2060_vm3, %v2397_v30  ;;  %5164 = vrcp.f32 %v2330_v60  ;;  %v3840_v60 = vld [vmem:[#allocation8 + $0x48] sm:$0xff] }
 0x4fd   :  { %v5155_v54 = vpop.eup %5154  ;;  %4477 = vmatmul.mubr.msk.f32.vlgmr.msra.gmra.mrb[26].mxu0 %vm2060_vm3, %v2398_v21  ;;  %v2327_v39 = vpop.xlane.xlu1 %2326  ;;  %v4812_v30 = vpack.c.bf16 %v3840_v60, %v3839_v2  ;;  %v3842_v21 = vld [vmem:[#allocation8 + $0x58] sm:$0xff] }
 0x4fe   :  { %v2399_v27 = vmul.f32 %v5155_v54, %v6085_v45  ;;  %4775 = vmatpush3.bf16.msra.mxu0 %v4772_v56  ;;  %5166 = vrcp.f32 %v2327_v39  ;;  %v5157_v34 = vpop.eup %5156  ;;  %v4816_v54 = vpack.c.bf16 %v3842_v21, %v3841_v42  ;;  %v4820_v39 = vpack.c.bf16 %v3844_v49, %v3843_v24 }
 0x4ff   :  { %4781 = vmatprep.subr.bf16.mxu0 %v5573_v33  ;;  %v2402_v5 = vmul.f32 %v5157_v34, %v6087_v29 }
 0x500   :  { %4483 = vmatprep.mubr.msk.f32.mxu1 %vm2060_vm3, %v2399_v27  ;;  %v3845_v27 = vld [vmem:[#allocation8 + $0x70] sm:$0xff] }
 0x501   :  { %v5159_v12 = vpop.eup %5158  ;;  %4484 = vmatmul.mubr.msk.f32.vlgmr.msra.gmra.mrb[46].mxu1 %vm2060_vm3, %v2400_v63  ;;  %v2336_v14 = vpop.xlane.xlu0 %2335  ;;  %v3846_v63 = vld [vmem:[#allocation8 + $0x78] sm:$0xff] }
 0x502   :  { %4779 = vmatpush3.bf16.msra.mxu1 %v4776_v57  ;;  %v2401_v11 = vmul.f32 %v5159_v12, %v6094_v40  ;;  %v5161_v45 = vpop.eup %5160  ;;  %5168 = vrcp.f32 %v2336_v14  ;;  %v4808_v57 = vpack.c.bf16 %v3838_v43, %v3837_v62  ;;  %v4824_v34 = vpack.c.bf16 %v3846_v63, %v3845_v27 }
 0x503   :  { %4785 = vmatprep.subr.bf16.mxu1 %v4784_v53  ;;  %v2404_v44 = vmul.f32 %v5161_v45, %v6096_v55 }
 0x504   :  { %4490 = vmatprep.mubr.msk.f32.mxu0 %vm2060_vm3, %v2401_v11  ;;  %v2333_v3 = vpop.xlane.xlu1 %2332 }
 0x505   :  { %v5163_v61 = vpop.eup %5162  ;;  %4491 = vmatmul.mubr.msk.f32.vlgmr.msra.gmra.mrb[28].mxu0 %vm2060_vm3, %v2402_v5  ;;  %5170 = vrcp.f32 %v2333_v3  ;;  %v2342_v50 = vpop.xlane.xlu0 %2341 }
 0x506   :  { %4783 = vmatpush3.bf16.msra.mxu0 %v5573_v33  ;;  %v2403_v10 = vmul.f32 %v5163_v61, %v6104_v26  ;;  %v5165_v40 = vpop.eup %5164 }
 0x507   :  { %v2406_v33 = vmul.f32 %v5165_v40, %v6106_v9 }
 0x508   :  { %4497 = vmatprep.mubr.msk.f32.mxu1 %vm2060_vm3, %v2403_v10  ;;  %v5167_v29 = vpop.eup %5166  ;;  %v2339_v7 = vpop.xlane.xlu1 %2338 }
 0x509   :  { %4498 = vmatmul.mubr.msk.f32.vlgmr.msra.gmra.mrb[48].mxu1 %vm2060_vm3, %v2404_v44  ;;  %5172 = vrcp.f32 %v2339_v7  ;;  %v2348_v23 = vpop.xlane.xlu0 %2347  ;;  %v2405_v36 = vmul.f32 %v5167_v29, %v6114_v13 }
 0x50a   :  { %4787 = vmatpush3.bf16.msra.mxu1 %v4784_v53  ;;  %5174 = vrcp.f32 %v2342_v50 }
 0x50b   :  { %4504 = vmatprep.mubr.msk.f32.mxu0 %vm2060_vm3, %v2405_v36  ;;  %5176 = vrcp.f32 %v2348_v23 }
 0x50c   :  { %v4973_v26 = vpop.permute.xlu1 %4972  ;;  %4505 = vmatmul.mubr.msk.f32.vlgmr.msra.gmra.mrb[30].mxu0 %vm2060_vm3, %v2406_v33  ;;  %v5169_v37 = vpop.eup %5168 }
 0x50d   :  { %v4975_v55 = vunpack.i.h.bf16 %v4973_v26  ;;  %v4974_v47 = vunpack.i.l.bf16 %v4973_v26  ;;  %v2345_v22 = vpop.xlane.xlu0 %2344  ;;  %v2408_v13 = vmul.f32 %v5169_v37, %v6122_v31 }
 0x50e   :  { %5178 = vrcp.f32 %v2345_v22 }
 0x50f   :  { %v5171_v15 = vpop.eup %5170  ;;  %v4792_v59 = vpack.c.bf16 %v4975_v55, %v4974_v47 }
 0x510   :  { %v2407_v41 = vmul.f32 %v5171_v15, %v6129_v16 }
 0x511   :  { %v4968_v35 = vpop.permute.xlu0 %4967  ;;  %4793 = vmatprep.subr.bf16.mxu1 %v4792_v59 }
 0x512   :  { %v4970_v9 = vunpack.i.h.bf16 %v4968_v35  ;;  %v4969_v19 = vunpack.i.l.bf16 %v4968_v35  ;;  %4511 = vmatprep.mubr.msk.f32.mxu1 %vm2060_vm3, %v2407_v41 }
 0x513   :  { %v5173_v6 = vpop.eup %5172  ;;  %4512 = vmatmul.mubr.msk.f32.vlgmr.msra.gmra.mrb[50].mxu1 %vm2060_vm3, %v2408_v13 }
 0x514   :  { %v4788_v20 = vpack.c.bf16 %v4970_v9, %v4969_v19  ;;  %4795 = vmatpush3.bf16.msra.mxu1 %v4792_v59  ;;  %v2409_v28 = vmul.f32 %v5173_v6, %v6137_v1  ;;  %v5175_v18 = vpop.eup %5174 }
 0x515   :  { %v5177_v16 = vpop.eup %5176  ;;  %v2410_v0 = vmul.f32 %v5175_v18, %v6131_v4  ;;  %v4800_v4 = vpack.c.bf16 %v3834_v38, %v3833_v52 }
 0x516   :  { %4789 = vmatprep.subr.bf16.mxu0 %v4788_v20  ;;  %4518 = vmatprep.mubr.msk.f32.mxu0 %vm2060_vm3, %v2409_v28  ;;  %v2412_v58 = vmul.f32 %v5177_v16, %v6139_v51 }
 0x517   :  { %4791 = vmatpush3.bf16.msra.mxu0 %v4788_v20 }
 0x518   :  { %v5179_v31 = vpop.eup %5178  ;;  %4797 = vmatprep.subr.bf16.mxu0 %v4796_v32 }
 0x519   :  { %v2411_v46 = vmul.f32 %v5179_v31, %v6145_v48  ;;  %v3836_v48 = vld [vmem:[#allocation8 + $0x28] sm:$0xff] }
 0x51a   :  { %4519 = vmatmul.mubr.msk.f32.vlgmr.msra.gmra.mrb[32].mxu0 %vm2060_vm3, %v2410_v0  ;;  %v4804_v51 = vpack.c.bf16 %v3836_v48, %v3835_v25 }
 0x51b   :  { %4525 = vmatprep.mubr.msk.f32.mxu1 %vm2060_vm3, %v2411_v46  ;;  %4799 = vmatpush3.bf16.msra.mxu0 %v4796_v32 }
 0x51c   :  { %4526 = vmatmul.mubr.msk.f32.vlgmr.msra.gmra.mrb[52].mxu1 %vm2060_vm3, %v2412_v58  ;;  %4801 = vmatprep.subr.bf16.mxu0 %v4800_v4 }
 0x51f   :  { %4803 = vmatpush3.bf16.msra.mxu0 %v4800_v4 }
 0x520   :  { %4805 = vmatprep.subr.bf16.mxu0 %v4804_v51 }
 0x523   :  { %4807 = vmatpush3.bf16.msra.mxu0 %v4804_v51 }
 0x524   :  { %4809 = vmatprep.subr.bf16.mxu0 %v4808_v57 }
 0x527   :  { %4811 = vmatpush3.bf16.msra.mxu0 %v4808_v57 }
 0x528   :  { %4813 = vmatprep.subr.bf16.mxu0 %v4812_v30 }
 0x52b   :  { %4815 = vmatpush3.bf16.msra.mxu0 %v4812_v30 }
 0x52c   :  { %4817 = vmatprep.subr.bf16.mxu0 %v4816_v54 }
 0x52f   :  { %4819 = vmatpush3.bf16.msra.mxu0 %v4816_v54 }
 0x530   :  { %4821 = vmatprep.subr.bf16.mxu0 %v4820_v39 }
 0x533   :  { %4823 = vmatpush3.bf16.msra.mxu0 %v4820_v39 }
 0x534   :  { %4825 = vmatprep.subr.bf16.mxu0 %v4824_v34 }
 0x537   :  { %4827 = vmatpush3.bf16.msra.mxu0 %v4824_v34 }
 0x545   :  { %v6237_v1 = vpop.f32.mrb[18].mxu0 }
 0x546   :  { %v6239_v56 = vpop.f32.mrb[19].mxu0 }
 0x5b2   :  { %v4429_v12 = vpop.f32.mrb[38].mxu1 }
 0x5b3   :  { %v2566_v53 = vpop.f32.mrb[39].mxu1 }
 0x5b4   :  { %v4976_v14 = vpack.i.bf16 %v4429_v12, %v2566_v53 }
 0x5b6   :  { %v4436_v11 = vpop.f32.mrb[20].mxu0  ;;  %4977 = vrot.lane.b32.xlu0 %v4976_v14, %s5284_s19 }
 0x5b7   :  { %v2647_v5 = vpop.f32.mrb[21].mxu0 }
 0x5b8   :  { %v4981_v45 = vpack.i.bf16 %v4436_v11, %v2647_v5 }
 0x5ba   :  { %4982 = vrot.lane.b32.xlu1 %v4981_v45, %s5283_s3 }
 0x5bb   :  { %v4443_v61 = vpop.f32.mrb[40].mxu1 }
 0x5bc   :  { %v2728_v3 = vpop.f32.mrb[41].mxu1 }
 0x5bd   :  { %v4986_v50 = vpack.i.bf16 %v4443_v61, %v2728_v3 }
 0x5bf   :  { %4987 = vrot.lane.b32.xlu0 %v4986_v50, %s5282_s2  ;;  %v6244_v10 = vpop.f32.mrb[22].mxu0 }
 0x5c0   :  { %v6246_v44 = vpop.f32.mrb[23].mxu0 }
 0x5c3   :  { %v4457_v40 = vpop.f32.mrb[42].mxu1 }
 0x5c4   :  { %v2890_v29 = vpop.f32.mrb[43].mxu1 }
 0x5c5   :  { %v4991_v7 = vpack.i.bf16 %v4457_v40, %v2890_v29 }
 0x5c7   :  { %4992 = vrot.lane.b32.xlu1 %v4991_v7, %s5284_s19  ;;  %v4464_v23 = vpop.f32.mrb[24].mxu0 }
 0x5c8   :  { %v2971_v36 = vpop.f32.mrb[25].mxu0 }
 0x5c9   :  { %v4996_v33 = vpack.i.bf16 %v4464_v23, %v2971_v36 }
 0x5cb   :  { %4997 = vrot.lane.b32.xlu0 %v4996_v33, %s5283_s3 }
 0x5cc   :  { %v4471_v26 = vpop.f32.mrb[44].mxu1 }
 0x5cd   :  { %v3052_v55 = vpop.f32.mrb[45].mxu1 }
 0x5ce   :  { %v5001_v47 = vpack.i.bf16 %v4471_v26, %v3052_v55 }
 0x5d0   :  { %5002 = vrot.lane.b32.xlu1 %v5001_v47, %s5282_s2  ;;  %v6251_v22 = vpop.f32.mrb[26].mxu0 }
 0x5d1   :  { %v6253_v37 = vpop.f32.mrb[27].mxu0 }
 0x5d4   :  { %v4485_v15 = vpop.f32.mrb[46].mxu1 }
 0x5d5   :  { %v3214_v59 = vpop.f32.mrb[47].mxu1 }
 0x5d6   :  { %v5006_v41 = vpack.i.bf16 %v4485_v15, %v3214_v59 }
 0x5d8   :  { %5007 = vrot.lane.b32.xlu0 %v5006_v41, %s5284_s19  ;;  %v4492_v13 = vpop.f32.mrb[28].mxu0 }
 0x5d9   :  { %v3295_v35 = vpop.f32.mrb[29].mxu0 }
 0x5da   :  { %v5011_v9 = vpack.i.bf16 %v4492_v13, %v3295_v35 }
 0x5dc   :  { %5012 = vrot.lane.b32.xlu1 %v5011_v9, %s5283_s3  ;;  %v4499_v19 = vpop.f32.mrb[48].mxu1 }
 0x5dd   :  { %v3376_v6 = vpop.f32.mrb[49].mxu1 }
 0x5de   :  { %v5016_v20 = vpack.i.bf16 %v4499_v19, %v3376_v6 }
 0x5df   :  { %v6258_v28 = vpop.f32.mrb[30].mxu0 }
 0x5e0   :  { %5017 = vrot.lane.b32.xlu0 %v5016_v20, %s5282_s2  ;;  %v6260_v18 = vpop.f32.mrb[31].mxu0 }
 0x5e6   :  { %v4513_v16 = vpop.f32.mrb[50].mxu1 }
 0x5e7   :  { %v3538_v31 = vpop.f32.mrb[51].mxu1 }
 0x5e8   :  { %v5021_v0 = vpack.i.bf16 %v4513_v16, %v3538_v31 }
 0x5ea   :  { %5022 = vrot.lane.b32.xlu1 %v5021_v0, %s5284_s19 }
 0x5ed   :  { %v4520_v46 = vpop.f32.mrb[32].mxu0 }
 0x5ee   :  { %v3619_v58 = vpop.f32.mrb[33].mxu0 }
 0x5ef   :  { %v5026_v17 = vpack.i.bf16 %v4520_v46, %v3619_v58  ;;  %v4527_v8 = vpop.f32.mrb[52].mxu1 }
 0x5f0   :  { %v3700_v52 = vpop.f32.mrb[53].mxu1 }
 0x5f1   :  { %v5031_v32 = vpack.i.bf16 %v4527_v8, %v3700_v52  ;;  %5027 = vrot.lane.b32.xlu0 %v5026_v17, %s5283_s3  ;;  %v4083_v52 = vld [vmem:[%s6321_s6] ss:$0 sm:$0xff]  ;;  %s3972_s6 = sshll.u32 %s5285_s23, 4  ;;  %s3973_s6 = int_to_ptr.vmem [resolvable:$true] %s3972_s6 }
 0x5f2   :  { %s5246_s24 = scalar_lea.vmem %s3973_s6, 1024  ;;  %p5251_p11 = scmp.lt.s32.totalorder %s3973_s6, %s3973_s6 }
 0x5f3   :  { %5032 = vrot.lane.b32.xlu1 %v5031_v32, %s5282_s2  ;;  %p5247_p10 = scmp.ne.s32.totalorder %s3973_s6, %s5246_s24  ;;  %p5252_p12 = scmp.lt.s32.totalorder %s5246_s24, %s5246_s24 }
 0x5f5   :  { %p5253_p13 = por %p5252_p12, %p5251_p11 }
 0x5f7   :  { %p5254_p0 = pnand %p5253_p13, %p5247_p10 }
 0x628   :  { %v4978_v38 = vpop.permute.xlu0 %4977 }
 0x629   :  { %v4980_v25 = vunpack.i.h.bf16 %v4978_v38  ;;  %v4979_v48 = vunpack.i.l.bf16 %v4978_v38 }
 0x62b   :  { %v3806_v57 = vsel %vm655_vm0, %v6237_v1, %v4980_v25  ;;  %v3805_v30 = vsel %vm655_vm0, %v6239_v56, %v4979_v48 }
 0x62c   :  { %v4983_v4 = vpop.permute.xlu1 %4982 }
 0x62d   :  { %v4985_v51 = vunpack.i.h.bf16 %v4983_v4  ;;  %v4984_v62 = vunpack.i.l.bf16 %v4983_v4 }
 0x62f   :  { %v3814_v42 = vsel %vm3813_vm5, %v3805_v30, %v4984_v62  ;;  %v3815_v21 = vsel %vm3813_vm5, %v3806_v57, %v4985_v51 }
 0x631   :  { %v4988_v43 = vpop.permute.xlu0 %4987 }
 0x632   :  { %v4990_v2 = vunpack.i.h.bf16 %v4988_v43  ;;  %v4989_v60 = vunpack.i.l.bf16 %v4988_v43 }
 0x634   :  { %v3823_v54 = vsel %vm3822_vm6, %v3814_v42, %v4989_v60  ;;  %v3824_v24 = vsel %vm3822_vm6, %v3815_v21, %v4990_v2 }
 0x635   :  { %4560 = vmatprep.mubr.f32.mxu0 %v3823_v54 }
 0x636   :  { %4561 = vmatmul.mubr.f32.vlgmr.msra.gmra.mrb[34].mxu0 %v3824_v24 }
 0x639   :  { %v4993_v49 = vpop.permute.xlu1 %4992 }
 0x63a   :  { %v4995_v27 = vunpack.i.h.bf16 %v4993_v49  ;;  %v4994_v63 = vunpack.i.l.bf16 %v4993_v49 }
 0x63c   :  { %v3807_v56 = vsel %vm655_vm0, %v6246_v44, %v4994_v63  ;;  %v3808_v11 = vsel %vm655_vm0, %v6244_v10, %v4995_v27 }
 0x63d   :  { %v4998_v39 = vpop.permute.xlu0 %4997 }
 0x63e   :  { %v5000_v1 = vunpack.i.h.bf16 %v4998_v39  ;;  %v4999_v34 = vunpack.i.l.bf16 %v4998_v39 }
 0x640   :  { %v3816_v5 = vsel %vm3813_vm5, %v3807_v56, %v4999_v34  ;;  %v3817_v45 = vsel %vm3813_vm5, %v3808_v11, %v5000_v1 }
 0x642   :  { %v5003_v12 = vpop.permute.xlu1 %5002 }
 0x643   :  { %v5005_v53 = vunpack.i.h.bf16 %v5003_v12  ;;  %v5004_v14 = vunpack.i.l.bf16 %v5003_v12 }
 0x645   :  { %v3825_v61 = vsel %vm3822_vm6, %v3816_v5, %v5004_v14  ;;  %v3826_v3 = vsel %vm3822_vm6, %v3817_v45, %v5005_v53 }
 0x646   :  { %4563 = vmatprep.mubr.f32.mxu0 %v3825_v61 }
 0x647   :  { %4564 = vmatmul.mubr.f32.gmra.mrb[36].mxu0 %v3826_v3 }
 0x64a   :  { %v5008_v50 = vpop.permute.xlu0 %5007 }
 0x64b   :  { %v5010_v29 = vunpack.i.h.bf16 %v5008_v50  ;;  %v5009_v7 = vunpack.i.l.bf16 %v5008_v50 }
 0x64d   :  { %v3809_v10 = vsel %vm655_vm0, %v6253_v37, %v5009_v7  ;;  %v3810_v55 = vsel %vm655_vm0, %v6251_v22, %v5010_v29 }
 0x64e   :  { %v5013_v40 = vpop.permute.xlu1 %5012 }
 0x64f   :  { %v5015_v23 = vunpack.i.h.bf16 %v5013_v40  ;;  %v5014_v36 = vunpack.i.l.bf16 %v5013_v40 }
 0x651   :  { %v3818_v47 = vsel %vm3813_vm5, %v3809_v10, %v5014_v36  ;;  %v3819_v15 = vsel %vm3813_vm5, %v3810_v55, %v5015_v23 }
 0x652   :  { %v5018_v44 = vpop.permute.xlu0 %5017 }
 0x653   :  { %v5020_v33 = vunpack.i.h.bf16 %v5018_v44  ;;  %v5019_v26 = vunpack.i.l.bf16 %v5018_v44 }
 0x655   :  { %v3827_v59 = vsel %vm3822_vm6, %v3818_v47, %v5019_v26  ;;  %v3828_v41 = vsel %vm3822_vm6, %v3819_v15, %v5020_v33 }
 0x656   :  { %4566 = vmatprep.mubr.f32.mxu0 %v3827_v59 }
 0x657   :  { %4567 = vmatmul.mubr.f32.gmra.mrb[38].mxu0 %v3828_v41 }
 0x65c   :  { %v5023_v13 = vpop.permute.xlu1 %5022 }
 0x65d   :  { %v5025_v35 = vunpack.i.h.bf16 %v5023_v13  ;;  %v5024_v9 = vunpack.i.l.bf16 %v5023_v13 }
 0x65f   :  { %v3811_v22 = vsel %vm655_vm0, %v6260_v18, %v5024_v9  ;;  %v3812_v16 = vsel %vm655_vm0, %v6258_v28, %v5025_v35 }
 0x663   :  { %v5028_v19 = vpop.permute.xlu0 %5027 }
 0x664   :  { %v5030_v6 = vunpack.i.h.bf16 %v5028_v19  ;;  %v5029_v20 = vunpack.i.l.bf16 %v5028_v19 }
 0x665   :  { %v5033_v37 = vpop.permute.xlu1 %5032 }
 0x666   :  { %v5035_v31 = vunpack.i.h.bf16 %v5033_v37  ;;  %v5034_v0 = vunpack.i.l.bf16 %v5033_v37  ;;  %v3820_v46 = vsel %vm3813_vm5, %v3811_v22, %v5029_v20  ;;  %v3821_v58 = vsel %vm3813_vm5, %v3812_v16, %v5030_v6 }
 0x668   :  { %v3829_v17 = vsel %vm3822_vm6, %v3820_v46, %v5034_v0  ;;  %v3830_v8 = vsel %vm3822_vm6, %v3821_v58, %v5035_v31 }
 0x669   :  { %4569 = vmatprep.mubr.f32.mxu0 %v3829_v17 }
 0x66a   :  { %4570 = vmatmul.mubr.f32.gmra.mrb[40].mxu0 %v3830_v8 }
 0x709   :  { %v4562_v18 = vpop.f32.mrb[34].mxu0 }
 0x70a   :  { %v3926_v32 = vadd.f32 %v4562_v18, %v4083_v52  ;;  %v3920_v38 = vpop.f32.mrb[35].mxu0 }
 0x70b   :  { %v3921_v28 = vadd.f32 %v4083_v52, %v3920_v38 }
 0x70c   :  { %3960 = vst [vmem:[#allocation9 + $0x8] sm:$0xff] %v3926_v32 }
 0x70d   :  { %3959 = vst [vmem:[#allocation9] sm:$0xff] %v3921_v28 }
 0x71a   :  { %v4565_v4 = vpop.f32.mrb[36].mxu0 }
 0x71b   :  { %v3936_v25 = vadd.f32 %v4565_v4, %v4083_v52  ;;  %v3930_v48 = vpop.f32.mrb[37].mxu0 }
 0x71c   :  { %v3931_v51 = vadd.f32 %v4083_v52, %v3930_v48 }
 0x71d   :  { %3962 = vst [vmem:[#allocation9 + $0x18] sm:$0xff] %v3936_v25 }
 0x71e   :  { %3961 = vst [vmem:[#allocation9 + $0x10] sm:$0xff] %v3931_v51 }
 0x72a   :  { %v4568_v62 = vpop.f32.mrb[38].mxu0 }
 0x72b   :  { %v3946_v43 = vadd.f32 %v4568_v62, %v4083_v52  ;;  %v3940_v57 = vpop.f32.mrb[39].mxu0 }
 0x72c   :  { %v3941_v2 = vadd.f32 %v4083_v52, %v3940_v57 }
 0x72d   :  { %3964 = vst [vmem:[#allocation9 + $0x28] sm:$0xff] %v3946_v43 }
 0x72e   :  { %3963 = vst [vmem:[#allocation9 + $0x20] sm:$0xff] %v3941_v2 }
 0x73d   :  { %v4571_v60 = vpop.f32.mrb[40].mxu0 }
 0x73e   :  { %v3956_v30 = vadd.f32 %v4571_v60, %v4083_v52  ;;  %v3950_v42 = vpop.f32.mrb[41].mxu0 }
 0x73f   :  { %v3951_v21 = vadd.f32 %v4083_v52, %v3950_v42 }
 0x740   :  { %3966 = vst [vmem:[#allocation9 + $0x38] sm:$0xff] %v3956_v30 }
 0x741   :  { %3965 = vst [vmem:[#allocation9 + $0x30] sm:$0xff] %v3951_v21 }
 0x742   :  { %5257 = shalt.err (!%p5254_p0)
}
 0x743   :  { %s5258_s28 = scalar_lea.hbm %s6322_s7, 1024 }
 0x744   :  { %p5259_p1 = scmp.ne.s32.totalorder %s6322_s7, %s5258_s28  ;;  %p5262_p2 = scmp.lt.u32.totalorder %s5258_s28, %s6322_s7 }
 0x746   :  { %p5264_p3 = pnand %p5262_p2, %p5259_p1 }
 0x748   :  { %5267 = shalt.err (!%p5264_p3)
}
 0x749   :  { %3978 = dma.vmem_to_hbm [thread:$0]  %s3973_s6, 1024, %s6322_s7, [#allocation5], %s5278_s4, %s5278_s4, %s5279_s25  }
 0x74a   :  { %5272 = dma.done.wait [#allocation5], 1024  }
 0x74b   :  { %5273 = vsyncadd [#allocation5], 4294966272 }
 0x74c   :  { %3982 = vsyncpa [#allocation4], 1 }
 0x74d   :  { %3983 = vsyncpa [#allocation7], 1 }
 0x74e   :  { %3984 = vsyncpa [#allocation5], 1 }

</bundles_post_ra>
